<compile_context>
chip_gen: v6e
topology: v6e:2x2x1
jax: 0.10.0
libtpu: 0.0.40
codegen_flags: <defaults>
</compile_context>

<pallas_src>
import jax
import jax.numpy as jnp
from jax import lax
from jax.experimental import pallas as pl
from jax.experimental.pallas import tpu as pltpu

ORIG_DIM = 12          # C_in
EMBED_DIM = 32         # C_out
KSIZE = 11
PAD = (KSIZE - 1) // 2
BN_EPS = 1e-5


def _fill_windows(x_ref, xwin_ref):
    """Fill the per-tile halo windows for the current batch (runs at l == 0).

    x_ref    : (1, C_in, L)              whole-length channels-first block
    xwin_ref : (nL, C_in, TL + 2*PAD)    per-tile windows, persist across l

    All slices are static (t, k are Python ints) -> no dynamic lane offsets;
    only the 2*PAD boundary columns of the end windows are zero-filled.
    """
    n_l, c_in, tl_p = xwin_ref.shape
    tl = tl_p - 2 * PAD
    zeros = jnp.zeros((c_in, PAD), jnp.float32)
    for t in range(n_l):
        if t == 0:
            xwin_ref[t, :, :PAD] = zeros
        else:
            xwin_ref[t, :, :PAD] = x_ref[0, :, t * tl - PAD:t * tl]
        xwin_ref[t, :, PAD:PAD + tl] = x_ref[0, :, t * tl:(t + 1) * tl]
        if t == n_l - 1:
            xwin_ref[t, :, PAD + tl:] = zeros
        else:
            xwin_ref[t, :, PAD + tl:] = x_ref[0, :, (t + 1) * tl:(t + 1) * tl + PAD]


def _conv_tile(x_ref, w_ref, xwin_ref, col_ref):
    """Conv1d tile (C_out, TL) for grid step (b, l) as ONE im2col matmul.

    w_ref   : (C_out, K*C_in)  host-reshaped (optionally BN-scale-folded) weights
    col_ref : (K*C_in, TL)     stacked im2col RHS, fully rewritten every step
    """
    l = pl.program_id(1)
    c_in = x_ref.shape[1]
    tl = col_ref.shape[1]

    @pl.when(l == 0)                      # once per batch: build halo windows
    def _():
        _fill_windows(x_ref, xwin_ref)

    xw = xwin_ref[l]                      # (C_in, TL+2*PAD); dynamic index on leading axis only
    for k in range(KSIZE):                # stack K shifted views (static slices)
        col_ref[k * c_in:(k + 1) * c_in, :] = xw[:, k:k + tl]

    # single MXU pass: contraction depth K*C_in = 132 (vs 11 dots of depth 12)
    return jnp.dot(w_ref[...], col_ref[...], preferred_element_type=jnp.float32)


def stats_kernel(x_ref, w_ref, sum_ref, sumsq_ref, xwin_ref, col_ref):
    """Pass 1: per-(batch, channel) sum / sum-of-squares of the conv output.

    sum/sumsq blocks are (1, C_out, 1) per-batch partials resident across the
    l axis; the B partials are reduced on the host, keeping batch 'parallel'.
    """
    l = pl.program_id(1)

    @pl.when(l == 0)
    def _():
        sum_ref[...] = jnp.zeros_like(sum_ref)
        sumsq_ref[...] = jnp.zeros_like(sumsq_ref)

    y = _conv_tile(x_ref, w_ref, xwin_ref, col_ref)          # (C_out, TL) f32
    sum_ref[...] += jnp.sum(y, axis=1, keepdims=True)[None]
    sumsq_ref[...] += jnp.sum(y * y, axis=1, keepdims=True)[None]


def apply_kernel(x_ref, w_ref, shift_ref, o_ref, xwin_ref, col_ref):
    """Pass 2: conv with BN-scale-folded weights + shift, ReLU, lane-dense store."""
    y = _conv_tile(x_ref, w_ref, xwin_ref, col_ref)          # (C_out, TL) f32
    o_ref[0] = jnp.maximum(y + shift_ref[...], 0.0)


def dilated_stride_embed(x_blc, w_oik, bias, gamma, beta, *, tl=None):
    """x_blc: (B, L, C_in) -> (B, C_out, L); matches DilatedStrideEmbed.forward."""
    B, L, c_in = x_blc.shape
    c_out, _, K = w_oik.shape
    assert c_in == ORIG_DIM and c_out == EMBED_DIM and K == KSIZE

    # The module's own first op is x.permute(0, 2, 1); doing it here puts the
    # long L axis in the lane dimension for every kernel load/store.
    x = jnp.transpose(x_blc, (0, 2, 1)).astype(jnp.float32)            # (B, Cin, L)

    # im2col weights: row k*C_in + i  <->  w[o, i, k]  (matches the stacked RHS)
    w2d = jnp.transpose(w_oik, (0, 2, 1)).reshape(c_out, K * c_in).astype(jnp.float32)

    # Length tile: multiple of 128 (lane-dense unmasked output stores); fall
    # back to a single full-length tile for ragged L.
    # TODO(synk): pad ragged L up to a multiple of 128 (masking the tail out of
    # the BN statistics) instead of falling back to one whole-L tile.
    if tl is None:
        tl = next((t for t in (1024, 512, 256, 128) if L % t == 0), L)
    if L % tl != 0:
        tl = L
    n_l = L // tl

    x_spec = pl.BlockSpec((1, c_in, L), lambda b, l: (b, 0, 0))   # resident per batch
    w_spec = pl.BlockSpec((c_out, K * c_in), lambda b, l: (0, 0))
    stat_spec = pl.BlockSpec((1, c_out, 1), lambda b, l: (b, 0, 0))
    vec_spec = pl.BlockSpec((c_out, 1), lambda b, l: (0, 0))
    scratch = [pltpu.VMEM((n_l, c_in, tl + 2 * PAD), jnp.float32),  # halo windows
               pltpu.VMEM((K * c_in, tl), jnp.float32)]             # im2col RHS

    # ---- pass 1: per-batch conv-output sums / sums-of-squares ---------------
    sums, sumsqs = pl.pallas_call(
        stats_kernel,
        out_shape=(jax.ShapeDtypeStruct((B, c_out, 1), jnp.float32),
                   jax.ShapeDtypeStruct((B, c_out, 1), jnp.float32)),
        grid=(B, n_l),
        in_specs=[x_spec, w_spec],
        out_specs=(stat_spec, stat_spec),
        scratch_shapes=scratch,
        compiler_params=pltpu.CompilerParams(
            dimension_semantics=("parallel", "arbitrary")),
    )(x, w2d)

    # ---- tiny (C_out,)-sized host math: fold BN into the pass-2 weights -----
    # Batch-stats BN subtracts the per-channel batch mean, so the conv bias
    # cancels exactly; `bias` is accepted for API fidelity but not needed.
    # NOTE: var = E[y^2] - E[y]^2 in f32 is cancellation-prone when
    # |mean(conv)| >> std(conv); fine for zero-mean-ish activations
    # (validated against the f32 reference below).
    n = float(B * L)
    mean_conv = jnp.sum(sums, axis=0) / n                    # (C_out, 1)
    var = jnp.sum(sumsqs, axis=0) / n - mean_conv * mean_conv
    g = gamma.reshape(c_out, 1).astype(jnp.float32)
    be = beta.reshape(c_out, 1).astype(jnp.float32)
    scale = g * lax.rsqrt(var + BN_EPS)
    shift = be - scale * mean_conv
    w2d_scaled = w2d * scale                                 # scale rides inside the MXU

    # ---- pass 2: recomputed conv (scaled weights) + shift + ReLU ------------
    out = pl.pallas_call(
        apply_kernel,
        out_shape=jax.ShapeDtypeStruct((B, c_out, L), jnp.float32),
        grid=(B, n_l),
        in_specs=[x_spec, w_spec, vec_spec],
        out_specs=pl.BlockSpec((1, c_out, tl), lambda b, l: (b, 0, l)),
        scratch_shapes=scratch,
        compiler_params=pltpu.CompilerParams(
            dimension_semantics=("parallel", "arbitrary")),
    )(x, w2d_scaled, shift)
    return out


def reference(x, w_oik, bias, gamma, beta):
    """Pure-JAX reference mirroring the PyTorch forward (f32)."""
    xc = jnp.transpose(x, (0, 2, 1)).astype(jnp.float32)               # (B, Cin, L)
    y = lax.conv_general_dilated(
        xc, w_oik.astype(jnp.float32),
        window_strides=(1,), padding=[(PAD, PAD)],
        dimension_numbers=("NCH", "OIH", "NCH"))
    y = y + bias[None, :, None]
    mean = jnp.mean(y, axis=(0, 2), keepdims=True)
    var = jnp.mean((y - mean) ** 2, axis=(0, 2), keepdims=True)
    y = (y - mean) * lax.rsqrt(var + BN_EPS)
    y = y * gamma[None, :, None] + beta[None, :, None]
    return jnp.maximum(y, 0.0)


if __name__ == "__main__":
    key = jax.random.PRNGKey(0)
    kx, kw, kb, kg, kbe = jax.random.split(key, 5)

    # Small shapes: B=2 batches, L=384 = 3 tiles of 128 so the tiled grid,
    # halo windows and per-batch accumulator re-init are all exercised.
    B, L = 2, 384
    x = jax.random.normal(kx, (B, L, ORIG_DIM), jnp.float32)

    # synthetic parameters with the nn.Conv1d / nn.BatchNorm1d shapes
    w_oik = 0.1 * jax.random.normal(kw, (EMBED_DIM, ORIG_DIM, KSIZE), jnp.float32)
    bias = 0.1 * jax.random.normal(kb, (EMBED_DIM,), jnp.float32)
    gamma = 1.0 + 0.1 * jax.random.normal(kg, (EMBED_DIM,), jnp.float32)
    beta = 0.1 * jax.random.normal(kbe, (EMBED_DIM,), jnp.float32)

    fwd = jax.jit(dilated_stride_embed, static_argnames=("tl",))
    out = jax.block_until_ready(fwd(x, w_oik, bias, gamma, beta))

    ref = jax.block_until_ready(reference(x, w_oik, bias, gamma, beta))
    assert out.shape == (B, EMBED_DIM, L), out.shape
    max_err = float(jnp.max(jnp.abs(out - ref)))
    assert jnp.allclose(out, ref, rtol=1e-4, atol=1e-4), max_err

    print("KERNEL_OK")
</pallas_src>

<mosaic_0001>
module attributes {stable_mosaic.version = 11 : i64} {
  func.func @stats_kernel(%arg0: i32, %arg1: i32, %arg2: memref<1x12x384xf32, #tpu.memory_space<vmem>>, %arg3: memref<32x132xf32, #tpu.memory_space<vmem>>, %arg4: memref<1x32x1xf32, #tpu.memory_space<vmem>>, %arg5: memref<1x32x1xf32, #tpu.memory_space<vmem>>, %arg6: memref<3x12x138xf32, #tpu.memory_space<vmem>>, %arg7: memref<132x128xf32, #tpu.memory_space<vmem>>) attributes {dimension_semantics = [#tpu.dimension_semantics<parallel>, #tpu.dimension_semantics<arbitrary>], iteration_bounds = array<i64: 2, 3>, scalar_prefetch = 0 : i64, scratch_operands = 2 : i64, tpu.core_type = #tpu.core_type<tc>, window_params = [{transform_indices = @transform_0, window_bounds = array<i64: 1, 12, 384>}, {pipeline_mode = #tpu.pipeline_mode<synchronous>, transform_indices = @transform_1, window_bounds = array<i64: 32, 132>}, {transform_indices = @transform_2, window_bounds = array<i64: 1, 32, 1>}, {transform_indices = @transform_3, window_bounds = array<i64: 1, 32, 1>}]} {
    %c0_i32 = arith.constant 0 : i32
    %0 = arith.cmpi eq, %arg1, %c0_i32 : i32
    %1 = arith.extui %0 : i1 to i32
    %c0_i32_0 = arith.constant 0 : i32
    %2 = arith.cmpi ne, %1, %c0_i32_0 : i32
    scf.if %2 {
      %cst_34 = arith.constant 0.000000e+00 : f32
      %47 = vector.broadcast %cst_34 : f32 to vector<1x32x1xf32>
      %c0_35 = arith.constant 0 : index
      %c0_36 = arith.constant 0 : index
      %c0_37 = arith.constant 0 : index
      %48 = vector.load %arg4[%c0_35, %c0_36, %c0_37] : memref<1x32x1xf32, #tpu.memory_space<vmem>>, vector<1x32x1xf32>
      tpu.vector_store %arg4[%c0_35, %c0_36, %c0_37], %47 {strides = array<i32>} : memref<1x32x1xf32, #tpu.memory_space<vmem>>, vector<1x32x1xf32>,
      %cst_38 = arith.constant 0.000000e+00 : f32
      %49 = vector.broadcast %cst_38 : f32 to vector<1x32x1xf32>
      %c0_39 = arith.constant 0 : index
      %c0_40 = arith.constant 0 : index
      %c0_41 = arith.constant 0 : index
      %50 = vector.load %arg5[%c0_39, %c0_40, %c0_41] : memref<1x32x1xf32, #tpu.memory_space<vmem>>, vector<1x32x1xf32>
      tpu.vector_store %arg5[%c0_39, %c0_40, %c0_41], %49 {strides = array<i32>} : memref<1x32x1xf32, #tpu.memory_space<vmem>>, vector<1x32x1xf32>,
    } else {
    }
    %c0_i32_1 = arith.constant 0 : i32
    %3 = arith.cmpi eq, %arg1, %c0_i32_1 : i32
    %4 = arith.extui %3 : i1 to i32
    %c0_i32_2 = arith.constant 0 : i32
    %5 = arith.cmpi ne, %4, %c0_i32_2 : i32
    scf.if %5 {
      %cst_34 = arith.constant 0.000000e+00 : f32
      %47 = vector.broadcast %cst_34 : f32 to vector<12x5xf32>
      %c0_35 = arith.constant 0 : index
      %c0_36 = arith.constant 0 : index
      %c0_37 = arith.constant 0 : index
      %48 = vector.load %arg6[%c0_35, %c0_36, %c0_37] : memref<3x12x138xf32, #tpu.memory_space<vmem>>, vector<1x12x5xf32>
      %49 = vector.shape_cast %48 : vector<1x12x5xf32> to vector<12x5xf32>
      %50 = vector.shape_cast %47 : vector<12x5xf32> to vector<1x12x5xf32>
      tpu.vector_store %arg6[%c0_35, %c0_36, %c0_37], %50 {strides = array<i32>} : memref<3x12x138xf32, #tpu.memory_space<vmem>>, vector<1x12x5xf32>,
      %c0_38 = arith.constant 0 : index
      %c0_39 = arith.constant 0 : index
      %c0_40 = arith.constant 0 : index
      %51 = vector.load %arg2[%c0_38, %c0_39, %c0_40] : memref<1x12x384xf32, #tpu.memory_space<vmem>>, vector<1x12x128xf32>
      %52 = vector.shape_cast %51 : vector<1x12x128xf32> to vector<12x128xf32>
      %c0_41 = arith.constant 0 : index
      %c0_42 = arith.constant 0 : index
      %c5 = arith.constant 5 : index
      %53 = vector.load %arg6[%c0_41, %c0_42, %c5] : memref<3x12x138xf32, #tpu.memory_space<vmem>>, vector<1x12x128xf32>
      %54 = vector.shape_cast %53 : vector<1x12x128xf32> to vector<12x128xf32>
      %55 = vector.shape_cast %52 : vector<12x128xf32> to vector<1x12x128xf32>
      tpu.vector_store %arg6[%c0_41, %c0_42, %c5], %55 {strides = array<i32>} : memref<3x12x138xf32, #tpu.memory_space<vmem>>, vector<1x12x128xf32>,
      %c0_43 = arith.constant 0 : index
      %c0_44 = arith.constant 0 : index
      %c128 = arith.constant 128 : index
      %56 = vector.load %arg2[%c0_43, %c0_44, %c128] : memref<1x12x384xf32, #tpu.memory_space<vmem>>, vector<1x12x5xf32>
      %57 = vector.shape_cast %56 : vector<1x12x5xf32> to vector<12x5xf32>
      %c0_45 = arith.constant 0 : index
      %c0_46 = arith.constant 0 : index
      %c133 = arith.constant 133 : index
      %58 = vector.load %arg6[%c0_45, %c0_46, %c133] : memref<3x12x138xf32, #tpu.memory_space<vmem>>, vector<1x12x5xf32>
      %59 = vector.shape_cast %58 : vector<1x12x5xf32> to vector<12x5xf32>
      %60 = vector.shape_cast %57 : vector<12x5xf32> to vector<1x12x5xf32>
      tpu.vector_store %arg6[%c0_45, %c0_46, %c133], %60 {strides = array<i32>} : memref<3x12x138xf32, #tpu.memory_space<vmem>>, vector<1x12x5xf32>,
      %c0_47 = arith.constant 0 : index
      %c0_48 = arith.constant 0 : index
      %c123 = arith.constant 123 : index
      %61 = vector.load %arg2[%c0_47, %c0_48, %c123] : memref<1x12x384xf32, #tpu.memory_space<vmem>>, vector<1x12x5xf32>
      %62 = vector.shape_cast %61 : vector<1x12x5xf32> to vector<12x5xf32>
      %c1 = arith.constant 1 : index
      %c0_49 = arith.constant 0 : index
      %c0_50 = arith.constant 0 : index
      %63 = vector.load %arg6[%c1, %c0_49, %c0_50] : memref<3x12x138xf32, #tpu.memory_space<vmem>>, vector<1x12x5xf32>
      %64 = vector.shape_cast %63 : vector<1x12x5xf32> to vector<12x5xf32>
      %65 = vector.shape_cast %62 : vector<12x5xf32> to vector<1x12x5xf32>
      tpu.vector_store %arg6[%c1, %c0_49, %c0_50], %65 {strides = array<i32>} : memref<3x12x138xf32, #tpu.memory_space<vmem>>, vector<1x12x5xf32>,
      %c0_51 = arith.constant 0 : index
      %c0_52 = arith.constant 0 : index
      %c128_53 = arith.constant 128 : index
      %66 = vector.load %arg2[%c0_51, %c0_52, %c128_53] : memref<1x12x384xf32, #tpu.memory_space<vmem>>, vector<1x12x128xf32>
      %67 = vector.shape_cast %66 : vector<1x12x128xf32> to vector<12x128xf32>
      %c1_54 = arith.constant 1 : index
      %c0_55 = arith.constant 0 : index
      %c5_56 = arith.constant 5 : index
      %68 = vector.load %arg6[%c1_54, %c0_55, %c5_56] : memref<3x12x138xf32, #tpu.memory_space<vmem>>, vector<1x12x128xf32>
      %69 = vector.shape_cast %68 : vector<1x12x128xf32> to vector<12x128xf32>
      %70 = vector.shape_cast %67 : vector<12x128xf32> to vector<1x12x128xf32>
      tpu.vector_store %arg6[%c1_54, %c0_55, %c5_56], %70 {strides = array<i32>} : memref<3x12x138xf32, #tpu.memory_space<vmem>>, vector<1x12x128xf32>,
      %c0_57 = arith.constant 0 : index
      %c0_58 = arith.constant 0 : index
      %c256 = arith.constant 256 : index
      %71 = vector.load %arg2[%c0_57, %c0_58, %c256] : memref<1x12x384xf32, #tpu.memory_space<vmem>>, vector<1x12x5xf32>
      %72 = vector.shape_cast %71 : vector<1x12x5xf32> to vector<12x5xf32>
      %c1_59 = arith.constant 1 : index
      %c0_60 = arith.constant 0 : index
      %c133_61 = arith.constant 133 : index
      %73 = vector.load %arg6[%c1_59, %c0_60, %c133_61] : memref<3x12x138xf32, #tpu.memory_space<vmem>>, vector<1x12x5xf32>
      %74 = vector.shape_cast %73 : vector<1x12x5xf32> to vector<12x5xf32>
      %75 = vector.shape_cast %72 : vector<12x5xf32> to vector<1x12x5xf32>
      tpu.vector_store %arg6[%c1_59, %c0_60, %c133_61], %75 {strides = array<i32>} : memref<3x12x138xf32, #tpu.memory_space<vmem>>, vector<1x12x5xf32>,
      %c0_62 = arith.constant 0 : index
      %c0_63 = arith.constant 0 : index
      %c251 = arith.constant 251 : index
      %76 = vector.load %arg2[%c0_62, %c0_63, %c251] : memref<1x12x384xf32, #tpu.memory_space<vmem>>, vector<1x12x5xf32>
      %77 = vector.shape_cast %76 : vector<1x12x5xf32> to vector<12x5xf32>
      %c2 = arith.constant 2 : index
      %c0_64 = arith.constant 0 : index
      %c0_65 = arith.constant 0 : index
      %78 = vector.load %arg6[%c2, %c0_64, %c0_65] : memref<3x12x138xf32, #tpu.memory_space<vmem>>, vector<1x12x5xf32>
      %79 = vector.shape_cast %78 : vector<1x12x5xf32> to vector<12x5xf32>
      %80 = vector.shape_cast %77 : vector<12x5xf32> to vector<1x12x5xf32>
      tpu.vector_store %arg6[%c2, %c0_64, %c0_65], %80 {strides = array<i32>} : memref<3x12x138xf32, #tpu.memory_space<vmem>>, vector<1x12x5xf32>,
      %c0_66 = arith.constant 0 : index
      %c0_67 = arith.constant 0 : index
      %c256_68 = arith.constant 256 : index
      %81 = vector.load %arg2[%c0_66, %c0_67, %c256_68] : memref<1x12x384xf32, #tpu.memory_space<vmem>>, vector<1x12x128xf32>
      %82 = vector.shape_cast %81 : vector<1x12x128xf32> to vector<12x128xf32>
      %c2_69 = arith.constant 2 : index
      %c0_70 = arith.constant 0 : index
      %c5_71 = arith.constant 5 : index
      %83 = vector.load %arg6[%c2_69, %c0_70, %c5_71] : memref<3x12x138xf32, #tpu.memory_space<vmem>>, vector<1x12x128xf32>
      %84 = vector.shape_cast %83 : vector<1x12x128xf32> to vector<12x128xf32>
      %85 = vector.shape_cast %82 : vector<12x128xf32> to vector<1x12x128xf32>
      tpu.vector_store %arg6[%c2_69, %c0_70, %c5_71], %85 {strides = array<i32>} : memref<3x12x138xf32, #tpu.memory_space<vmem>>, vector<1x12x128xf32>,
      %c2_72 = arith.constant 2 : index
      %c0_73 = arith.constant 0 : index
      %c133_74 = arith.constant 133 : index
      %86 = vector.load %arg6[%c2_72, %c0_73, %c133_74] : memref<3x12x138xf32, #tpu.memory_space<vmem>>, vector<1x12x5xf32>
      %87 = vector.shape_cast %86 : vector<1x12x5xf32> to vector<12x5xf32>
      %88 = vector.shape_cast %47 : vector<12x5xf32> to vector<1x12x5xf32>
      tpu.vector_store %arg6[%c2_72, %c0_73, %c133_74], %88 {strides = array<i32>} : memref<3x12x138xf32, #tpu.memory_space<vmem>>, vector<1x12x5xf32>,
    } else {
    }
    %6 = arith.index_cast %arg1 : i32 to index
    %c0 = arith.constant 0 : index
    %c0_3 = arith.constant 0 : index
    %7 = vector.load %arg6[%6, %c0, %c0_3] : memref<3x12x138xf32, #tpu.memory_space<vmem>>, vector<1x12x138xf32>
    %8 = vector.shape_cast %7 : vector<1x12x138xf32> to vector<12x138xf32>
    %9 = vector.extract_strided_slice %8 {offsets = [0, 0], sizes = [12, 128], strides = [1, 1]} : vector<12x138xf32> to vector<12x128xf32>
    %c0_4 = arith.constant 0 : index
    %c0_5 = arith.constant 0 : index
    %10 = vector.load %arg7[%c0_4, %c0_5] : memref<132x128xf32, #tpu.memory_space<vmem>>, vector<12x128xf32>
    tpu.vector_store %arg7[%c0_4, %c0_5], %9 {strides = array<i32>} : memref<132x128xf32, #tpu.memory_space<vmem>>, vector<12x128xf32>,
    %11 = vector.extract_strided_slice %8 {offsets = [0, 1], sizes = [12, 128], strides = [1, 1]} : vector<12x138xf32> to vector<12x128xf32>
    %c12 = arith.constant 12 : index
    %c0_6 = arith.constant 0 : index
    %12 = vector.load %arg7[%c12, %c0_6] : memref<132x128xf32, #tpu.memory_space<vmem>>, vector<12x128xf32>
    tpu.vector_store %arg7[%c12, %c0_6], %11 {strides = array<i32>} : memref<132x128xf32, #tpu.memory_space<vmem>>, vector<12x128xf32>,
    %13 = vector.extract_strided_slice %8 {offsets = [0, 2], sizes = [12, 128], strides = [1, 1]} : vector<12x138xf32> to vector<12x128xf32>
    %c24 = arith.constant 24 : index
    %c0_7 = arith.constant 0 : index
    %14 = vector.load %arg7[%c24, %c0_7] : memref<132x128xf32, #tpu.memory_space<vmem>>, vector<12x128xf32>
    tpu.vector_store %arg7[%c24, %c0_7], %13 {strides = array<i32>} : memref<132x128xf32, #tpu.memory_space<vmem>>, vector<12x128xf32>,
    %15 = vector.extract_strided_slice %8 {offsets = [0, 3], sizes = [12, 128], strides = [1, 1]} : vector<12x138xf32> to vector<12x128xf32>
    %c36 = arith.constant 36 : index
    %c0_8 = arith.constant 0 : index
    %16 = vector.load %arg7[%c36, %c0_8] : memref<132x128xf32, #tpu.memory_space<vmem>>, vector<12x128xf32>
    tpu.vector_store %arg7[%c36, %c0_8], %15 {strides = array<i32>} : memref<132x128xf32, #tpu.memory_space<vmem>>, vector<12x128xf32>,
    %17 = vector.extract_strided_slice %8 {offsets = [0, 4], sizes = [12, 128], strides = [1, 1]} : vector<12x138xf32> to vector<12x128xf32>
    %c48 = arith.constant 48 : index
    %c0_9 = arith.constant 0 : index
    %18 = vector.load %arg7[%c48, %c0_9] : memref<132x128xf32, #tpu.memory_space<vmem>>, vector<12x128xf32>
    tpu.vector_store %arg7[%c48, %c0_9], %17 {strides = array<i32>} : memref<132x128xf32, #tpu.memory_space<vmem>>, vector<12x128xf32>,
    %19 = vector.extract_strided_slice %8 {offsets = [0, 5], sizes = [12, 128], strides = [1, 1]} : vector<12x138xf32> to vector<12x128xf32>
    %c60 = arith.constant 60 : index
    %c0_10 = arith.constant 0 : index
    %20 = vector.load %arg7[%c60, %c0_10] : memref<132x128xf32, #tpu.memory_space<vmem>>, vector<12x128xf32>
    tpu.vector_store %arg7[%c60, %c0_10], %19 {strides = array<i32>} : memref<132x128xf32, #tpu.memory_space<vmem>>, vector<12x128xf32>,
    %21 = vector.extract_strided_slice %8 {offsets = [0, 6], sizes = [12, 128], strides = [1, 1]} : vector<12x138xf32> to vector<12x128xf32>
    %c72 = arith.constant 72 : index
    %c0_11 = arith.constant 0 : index
    %22 = vector.load %arg7[%c72, %c0_11] : memref<132x128xf32, #tpu.memory_space<vmem>>, vector<12x128xf32>
    tpu.vector_store %arg7[%c72, %c0_11], %21 {strides = array<i32>} : memref<132x128xf32, #tpu.memory_space<vmem>>, vector<12x128xf32>,
    %23 = vector.extract_strided_slice %8 {offsets = [0, 7], sizes = [12, 128], strides = [1, 1]} : vector<12x138xf32> to vector<12x128xf32>
    %c84 = arith.constant 84 : index
    %c0_12 = arith.constant 0 : index
    %24 = vector.load %arg7[%c84, %c0_12] : memref<132x128xf32, #tpu.memory_space<vmem>>, vector<12x128xf32>
    tpu.vector_store %arg7[%c84, %c0_12], %23 {strides = array<i32>} : memref<132x128xf32, #tpu.memory_space<vmem>>, vector<12x128xf32>,
    %25 = vector.extract_strided_slice %8 {offsets = [0, 8], sizes = [12, 128], strides = [1, 1]} : vector<12x138xf32> to vector<12x128xf32>
    %c96 = arith.constant 96 : index
    %c0_13 = arith.constant 0 : index
    %26 = vector.load %arg7[%c96, %c0_13] : memref<132x128xf32, #tpu.memory_space<vmem>>, vector<12x128xf32>
    tpu.vector_store %arg7[%c96, %c0_13], %25 {strides = array<i32>} : memref<132x128xf32, #tpu.memory_space<vmem>>, vector<12x128xf32>,
    %27 = vector.extract_strided_slice %8 {offsets = [0, 9], sizes = [12, 128], strides = [1, 1]} : vector<12x138xf32> to vector<12x128xf32>
    %c108 = arith.constant 108 : index
    %c0_14 = arith.constant 0 : index
    %28 = vector.load %arg7[%c108, %c0_14] : memref<132x128xf32, #tpu.memory_space<vmem>>, vector<12x128xf32>
    tpu.vector_store %arg7[%c108, %c0_14], %27 {strides = array<i32>} : memref<132x128xf32, #tpu.memory_space<vmem>>, vector<12x128xf32>,
    %29 = vector.extract_strided_slice %8 {offsets = [0, 10], sizes = [12, 128], strides = [1, 1]} : vector<12x138xf32> to vector<12x128xf32>
    %c120 = arith.constant 120 : index
    %c0_15 = arith.constant 0 : index
    %30 = vector.load %arg7[%c120, %c0_15] : memref<132x128xf32, #tpu.memory_space<vmem>>, vector<12x128xf32>
    tpu.vector_store %arg7[%c120, %c0_15], %29 {strides = array<i32>} : memref<132x128xf32, #tpu.memory_space<vmem>>, vector<12x128xf32>,
    %c0_16 = arith.constant 0 : index
    %c0_17 = arith.constant 0 : index
    %31 = vector.load %arg3[%c0_16, %c0_17] : memref<32x132xf32, #tpu.memory_space<vmem>>, vector<32x132xf32>
    %c0_18 = arith.constant 0 : index
    %c0_19 = arith.constant 0 : index
    %32 = vector.load %arg7[%c0_18, %c0_19] : memref<132x128xf32, #tpu.memory_space<vmem>>, vector<132x128xf32>
    %cst = arith.constant dense<0.000000e+00> : vector<32x128xf32>
    %33 = tpu.matmul %31, %32, %cst {dimension_numbers = #tpu.dot_dimension_numbers<[1], [0], [0], [1], [0, 0, 1, 1], [], []>} : vector<32x132xf32>, vector<132x128xf32>, vector<32x128xf32> -> vector<32x128xf32>
    %c0_20 = arith.constant 0 : index
    %c0_21 = arith.constant 0 : index
    %c0_22 = arith.constant 0 : index
    %34 = vector.load %arg4[%c0_20, %c0_21, %c0_22] : memref<1x32x1xf32, #tpu.memory_space<vmem>>, vector<1x32x1xf32>
    %cst_23 = arith.constant dense<0.000000e+00> : vector<32xf32>
    %35 = vector.multi_reduction <add>, %33, %cst_23 [1] : vector<32x128xf32> to vector<32xf32>
    %36 = vector.shape_cast %35 : vector<32xf32> to vector<32x1xf32>
    %37 = vector.shape_cast %36 : vector<32x1xf32> to vector<1x32x1xf32>
    %38 = arith.addf %34, %37 : vector<1x32x1xf32>
    %c0_24 = arith.constant 0 : index
    %c0_25 = arith.constant 0 : index
    %c0_26 = arith.constant 0 : index
    %39 = vector.load %arg4[%c0_24, %c0_25, %c0_26] : memref<1x32x1xf32, #tpu.memory_space<vmem>>, vector<1x32x1xf32>
    tpu.vector_store %arg4[%c0_24, %c0_25, %c0_26], %38 {strides = array<i32>} : memref<1x32x1xf32, #tpu.memory_space<vmem>>, vector<1x32x1xf32>,
    %c0_27 = arith.constant 0 : index
    %c0_28 = arith.constant 0 : index
    %c0_29 = arith.constant 0 : index
    %40 = vector.load %arg5[%c0_27, %c0_28, %c0_29] : memref<1x32x1xf32, #tpu.memory_space<vmem>>, vector<1x32x1xf32>
    %41 = arith.mulf %33, %33 : vector<32x128xf32>
    %cst_30 = arith.constant dense<0.000000e+00> : vector<32xf32>
    %42 = vector.multi_reduction <add>, %41, %cst_30 [1] : vector<32x128xf32> to vector<32xf32>
    %43 = vector.shape_cast %42 : vector<32xf32> to vector<32x1xf32>
    %44 = vector.shape_cast %43 : vector<32x1xf32> to vector<1x32x1xf32>
    %45 = arith.addf %40, %44 : vector<1x32x1xf32>
    %c0_31 = arith.constant 0 : index
    %c0_32 = arith.constant 0 : index
    %c0_33 = arith.constant 0 : index
    %46 = vector.load %arg5[%c0_31, %c0_32, %c0_33] : memref<1x32x1xf32, #tpu.memory_space<vmem>>, vector<1x32x1xf32>
    tpu.vector_store %arg5[%c0_31, %c0_32, %c0_33], %45 {strides = array<i32>} : memref<1x32x1xf32, #tpu.memory_space<vmem>>, vector<1x32x1xf32>,
    return
  }
  func.func @transform_0(%arg0: i32, %arg1: i32) -> (i32, i32, i32) {
    %c0_i32 = arith.constant 0 : i32
    %c0_i32_0 = arith.constant 0 : i32
    %c0_i32_1 = arith.constant 0 : i32
    return %arg0, %c0_i32, %c0_i32_0 : i32, i32, i32
  }
  func.func @transform_1(%arg0: i32, %arg1: i32) -> (i32, i32) {
    %c0_i32 = arith.constant 0 : i32
    %c0_i32_0 = arith.constant 0 : i32
    %c0_i32_1 = arith.constant 0 : i32
    return %c0_i32, %c0_i32_0 : i32, i32
  }
  func.func @transform_2(%arg0: i32, %arg1: i32) -> (i32, i32, i32) {
    %c0_i32 = arith.constant 0 : i32
    %c0_i32_0 = arith.constant 0 : i32
    %c0_i32_1 = arith.constant 0 : i32
    return %arg0, %c0_i32, %c0_i32_0 : i32, i32, i32
  }
  func.func @transform_3(%arg0: i32, %arg1: i32) -> (i32, i32, i32) {
    %c0_i32 = arith.constant 0 : i32
    %c0_i32_0 = arith.constant 0 : i32
    %c0_i32_1 = arith.constant 0 : i32
    return %arg0, %c0_i32, %c0_i32_0 : i32, i32, i32
  }
}

module attributes {stable_mosaic.version = 11 : i64} {
  func.func @apply_kernel(%arg0: i32, %arg1: i32, %arg2: memref<1x12x384xf32, #tpu.memory_space<vmem>>, %arg3: memref<32x132xf32, #tpu.memory_space<vmem>>, %arg4: memref<32x1xf32, #tpu.memory_space<vmem>>, %arg5: memref<1x32x128xf32, #tpu.memory_space<vmem>>, %arg6: memref<3x12x138xf32, #tpu.memory_space<vmem>>, %arg7: memref<132x128xf32, #tpu.memory_space<vmem>>) attributes {dimension_semantics = [#tpu.dimension_semantics<parallel>, #tpu.dimension_semantics<arbitrary>], iteration_bounds = array<i64: 2, 3>, scalar_prefetch = 0 : i64, scratch_operands = 2 : i64, tpu.core_type = #tpu.core_type<tc>, window_params = [{transform_indices = @transform_0, window_bounds = array<i64: 1, 12, 384>}, {pipeline_mode = #tpu.pipeline_mode<synchronous>, transform_indices = @transform_1, window_bounds = array<i64: 32, 132>}, {pipeline_mode = #tpu.pipeline_mode<synchronous>, transform_indices = @transform_2, window_bounds = array<i64: 32, 1>}, {transform_indices = @transform_3, window_bounds = array<i64: 1, 32, 128>}]} {
    %c0_i32 = arith.constant 0 : i32
    %0 = arith.cmpi eq, %arg1, %c0_i32 : i32
    %1 = arith.extui %0 : i1 to i32
    %c0_i32_0 = arith.constant 0 : i32
    %2 = arith.cmpi ne, %1, %c0_i32_0 : i32
    scf.if %2 {
      %cst_24 = arith.constant 0.000000e+00 : f32
      %39 = vector.broadcast %cst_24 : f32 to vector<12x5xf32>
      %c0_25 = arith.constant 0 : index
      %c0_26 = arith.constant 0 : index
      %c0_27 = arith.constant 0 : index
      %40 = vector.load %arg6[%c0_25, %c0_26, %c0_27] : memref<3x12x138xf32, #tpu.memory_space<vmem>>, vector<1x12x5xf32>
      %41 = vector.shape_cast %40 : vector<1x12x5xf32> to vector<12x5xf32>
      %42 = vector.shape_cast %39 : vector<12x5xf32> to vector<1x12x5xf32>
      tpu.vector_store %arg6[%c0_25, %c0_26, %c0_27], %42 {strides = array<i32>} : memref<3x12x138xf32, #tpu.memory_space<vmem>>, vector<1x12x5xf32>,
      %c0_28 = arith.constant 0 : index
      %c0_29 = arith.constant 0 : index
      %c0_30 = arith.constant 0 : index
      %43 = vector.load %arg2[%c0_28, %c0_29, %c0_30] : memref<1x12x384xf32, #tpu.memory_space<vmem>>, vector<1x12x128xf32>
      %44 = vector.shape_cast %43 : vector<1x12x128xf32> to vector<12x128xf32>
      %c0_31 = arith.constant 0 : index
      %c0_32 = arith.constant 0 : index
      %c5 = arith.constant 5 : index
      %45 = vector.load %arg6[%c0_31, %c0_32, %c5] : memref<3x12x138xf32, #tpu.memory_space<vmem>>, vector<1x12x128xf32>
      %46 = vector.shape_cast %45 : vector<1x12x128xf32> to vector<12x128xf32>
      %47 = vector.shape_cast %44 : vector<12x128xf32> to vector<1x12x128xf32>
      tpu.vector_store %arg6[%c0_31, %c0_32, %c5], %47 {strides = array<i32>} : memref<3x12x138xf32, #tpu.memory_space<vmem>>, vector<1x12x128xf32>,
      %c0_33 = arith.constant 0 : index
      %c0_34 = arith.constant 0 : index
      %c128 = arith.constant 128 : index
      %48 = vector.load %arg2[%c0_33, %c0_34, %c128] : memref<1x12x384xf32, #tpu.memory_space<vmem>>, vector<1x12x5xf32>
      %49 = vector.shape_cast %48 : vector<1x12x5xf32> to vector<12x5xf32>
      %c0_35 = arith.constant 0 : index
      %c0_36 = arith.constant 0 : index
      %c133 = arith.constant 133 : index
      %50 = vector.load %arg6[%c0_35, %c0_36, %c133] : memref<3x12x138xf32, #tpu.memory_space<vmem>>, vector<1x12x5xf32>
      %51 = vector.shape_cast %50 : vector<1x12x5xf32> to vector<12x5xf32>
      %52 = vector.shape_cast %49 : vector<12x5xf32> to vector<1x12x5xf32>
      tpu.vector_store %arg6[%c0_35, %c0_36, %c133], %52 {strides = array<i32>} : memref<3x12x138xf32, #tpu.memory_space<vmem>>, vector<1x12x5xf32>,
      %c0_37 = arith.constant 0 : index
      %c0_38 = arith.constant 0 : index
      %c123 = arith.constant 123 : index
      %53 = vector.load %arg2[%c0_37, %c0_38, %c123] : memref<1x12x384xf32, #tpu.memory_space<vmem>>, vector<1x12x5xf32>
      %54 = vector.shape_cast %53 : vector<1x12x5xf32> to vector<12x5xf32>
      %c1 = arith.constant 1 : index
      %c0_39 = arith.constant 0 : index
      %c0_40 = arith.constant 0 : index
      %55 = vector.load %arg6[%c1, %c0_39, %c0_40] : memref<3x12x138xf32, #tpu.memory_space<vmem>>, vector<1x12x5xf32>
      %56 = vector.shape_cast %55 : vector<1x12x5xf32> to vector<12x5xf32>
      %57 = vector.shape_cast %54 : vector<12x5xf32> to vector<1x12x5xf32>
      tpu.vector_store %arg6[%c1, %c0_39, %c0_40], %57 {strides = array<i32>} : memref<3x12x138xf32, #tpu.memory_space<vmem>>, vector<1x12x5xf32>,
      %c0_41 = arith.constant 0 : index
      %c0_42 = arith.constant 0 : index
      %c128_43 = arith.constant 128 : index
      %58 = vector.load %arg2[%c0_41, %c0_42, %c128_43] : memref<1x12x384xf32, #tpu.memory_space<vmem>>, vector<1x12x128xf32>
      %59 = vector.shape_cast %58 : vector<1x12x128xf32> to vector<12x128xf32>
      %c1_44 = arith.constant 1 : index
      %c0_45 = arith.constant 0 : index
      %c5_46 = arith.constant 5 : index
      %60 = vector.load %arg6[%c1_44, %c0_45, %c5_46] : memref<3x12x138xf32, #tpu.memory_space<vmem>>, vector<1x12x128xf32>
      %61 = vector.shape_cast %60 : vector<1x12x128xf32> to vector<12x128xf32>
      %62 = vector.shape_cast %59 : vector<12x128xf32> to vector<1x12x128xf32>
      tpu.vector_store %arg6[%c1_44, %c0_45, %c5_46], %62 {strides = array<i32>} : memref<3x12x138xf32, #tpu.memory_space<vmem>>, vector<1x12x128xf32>,
      %c0_47 = arith.constant 0 : index
      %c0_48 = arith.constant 0 : index
      %c256 = arith.constant 256 : index
      %63 = vector.load %arg2[%c0_47, %c0_48, %c256] : memref<1x12x384xf32, #tpu.memory_space<vmem>>, vector<1x12x5xf32>
      %64 = vector.shape_cast %63 : vector<1x12x5xf32> to vector<12x5xf32>
      %c1_49 = arith.constant 1 : index
      %c0_50 = arith.constant 0 : index
      %c133_51 = arith.constant 133 : index
      %65 = vector.load %arg6[%c1_49, %c0_50, %c133_51] : memref<3x12x138xf32, #tpu.memory_space<vmem>>, vector<1x12x5xf32>
      %66 = vector.shape_cast %65 : vector<1x12x5xf32> to vector<12x5xf32>
      %67 = vector.shape_cast %64 : vector<12x5xf32> to vector<1x12x5xf32>
      tpu.vector_store %arg6[%c1_49, %c0_50, %c133_51], %67 {strides = array<i32>} : memref<3x12x138xf32, #tpu.memory_space<vmem>>, vector<1x12x5xf32>,
      %c0_52 = arith.constant 0 : index
      %c0_53 = arith.constant 0 : index
      %c251 = arith.constant 251 : index
      %68 = vector.load %arg2[%c0_52, %c0_53, %c251] : memref<1x12x384xf32, #tpu.memory_space<vmem>>, vector<1x12x5xf32>
      %69 = vector.shape_cast %68 : vector<1x12x5xf32> to vector<12x5xf32>
      %c2 = arith.constant 2 : index
      %c0_54 = arith.constant 0 : index
      %c0_55 = arith.constant 0 : index
      %70 = vector.load %arg6[%c2, %c0_54, %c0_55] : memref<3x12x138xf32, #tpu.memory_space<vmem>>, vector<1x12x5xf32>
      %71 = vector.shape_cast %70 : vector<1x12x5xf32> to vector<12x5xf32>
      %72 = vector.shape_cast %69 : vector<12x5xf32> to vector<1x12x5xf32>
      tpu.vector_store %arg6[%c2, %c0_54, %c0_55], %72 {strides = array<i32>} : memref<3x12x138xf32, #tpu.memory_space<vmem>>, vector<1x12x5xf32>,
      %c0_56 = arith.constant 0 : index
      %c0_57 = arith.constant 0 : index
      %c256_58 = arith.constant 256 : index
      %73 = vector.load %arg2[%c0_56, %c0_57, %c256_58] : memref<1x12x384xf32, #tpu.memory_space<vmem>>, vector<1x12x128xf32>
      %74 = vector.shape_cast %73 : vector<1x12x128xf32> to vector<12x128xf32>
      %c2_59 = arith.constant 2 : index
      %c0_60 = arith.constant 0 : index
      %c5_61 = arith.constant 5 : index
      %75 = vector.load %arg6[%c2_59, %c0_60, %c5_61] : memref<3x12x138xf32, #tpu.memory_space<vmem>>, vector<1x12x128xf32>
      %76 = vector.shape_cast %75 : vector<1x12x128xf32> to vector<12x128xf32>
      %77 = vector.shape_cast %74 : vector<12x128xf32> to vector<1x12x128xf32>
      tpu.vector_store %arg6[%c2_59, %c0_60, %c5_61], %77 {strides = array<i32>} : memref<3x12x138xf32, #tpu.memory_space<vmem>>, vector<1x12x128xf32>,
      %c2_62 = arith.constant 2 : index
      %c0_63 = arith.constant 0 : index
      %c133_64 = arith.constant 133 : index
      %78 = vector.load %arg6[%c2_62, %c0_63, %c133_64] : memref<3x12x138xf32, #tpu.memory_space<vmem>>, vector<1x12x5xf32>
      %79 = vector.shape_cast %78 : vector<1x12x5xf32> to vector<12x5xf32>
      %80 = vector.shape_cast %39 : vector<12x5xf32> to vector<1x12x5xf32>
      tpu.vector_store %arg6[%c2_62, %c0_63, %c133_64], %80 {strides = array<i32>} : memref<3x12x138xf32, #tpu.memory_space<vmem>>, vector<1x12x5xf32>,
    } else {
    }
    %3 = arith.index_cast %arg1 : i32 to index
    %c0 = arith.constant 0 : index
    %c0_1 = arith.constant 0 : index
    %4 = vector.load %arg6[%3, %c0, %c0_1] : memref<3x12x138xf32, #tpu.memory_space<vmem>>, vector<1x12x138xf32>
    %5 = vector.shape_cast %4 : vector<1x12x138xf32> to vector<12x138xf32>
    %6 = vector.extract_strided_slice %5 {offsets = [0, 0], sizes = [12, 128], strides = [1, 1]} : vector<12x138xf32> to vector<12x128xf32>
    %c0_2 = arith.constant 0 : index
    %c0_3 = arith.constant 0 : index
    %7 = vector.load %arg7[%c0_2, %c0_3] : memref<132x128xf32, #tpu.memory_space<vmem>>, vector<12x128xf32>
    tpu.vector_store %arg7[%c0_2, %c0_3], %6 {strides = array<i32>} : memref<132x128xf32, #tpu.memory_space<vmem>>, vector<12x128xf32>,
    %8 = vector.extract_strided_slice %5 {offsets = [0, 1], sizes = [12, 128], strides = [1, 1]} : vector<12x138xf32> to vector<12x128xf32>
    %c12 = arith.constant 12 : index
    %c0_4 = arith.constant 0 : index
    %9 = vector.load %arg7[%c12, %c0_4] : memref<132x128xf32, #tpu.memory_space<vmem>>, vector<12x128xf32>
    tpu.vector_store %arg7[%c12, %c0_4], %8 {strides = array<i32>} : memref<132x128xf32, #tpu.memory_space<vmem>>, vector<12x128xf32>,
    %10 = vector.extract_strided_slice %5 {offsets = [0, 2], sizes = [12, 128], strides = [1, 1]} : vector<12x138xf32> to vector<12x128xf32>
    %c24 = arith.constant 24 : index
    %c0_5 = arith.constant 0 : index
    %11 = vector.load %arg7[%c24, %c0_5] : memref<132x128xf32, #tpu.memory_space<vmem>>, vector<12x128xf32>
    tpu.vector_store %arg7[%c24, %c0_5], %10 {strides = array<i32>} : memref<132x128xf32, #tpu.memory_space<vmem>>, vector<12x128xf32>,
    %12 = vector.extract_strided_slice %5 {offsets = [0, 3], sizes = [12, 128], strides = [1, 1]} : vector<12x138xf32> to vector<12x128xf32>
    %c36 = arith.constant 36 : index
    %c0_6 = arith.constant 0 : index
    %13 = vector.load %arg7[%c36, %c0_6] : memref<132x128xf32, #tpu.memory_space<vmem>>, vector<12x128xf32>
    tpu.vector_store %arg7[%c36, %c0_6], %12 {strides = array<i32>} : memref<132x128xf32, #tpu.memory_space<vmem>>, vector<12x128xf32>,
    %14 = vector.extract_strided_slice %5 {offsets = [0, 4], sizes = [12, 128], strides = [1, 1]} : vector<12x138xf32> to vector<12x128xf32>
    %c48 = arith.constant 48 : index
    %c0_7 = arith.constant 0 : index
    %15 = vector.load %arg7[%c48, %c0_7] : memref<132x128xf32, #tpu.memory_space<vmem>>, vector<12x128xf32>
    tpu.vector_store %arg7[%c48, %c0_7], %14 {strides = array<i32>} : memref<132x128xf32, #tpu.memory_space<vmem>>, vector<12x128xf32>,
    %16 = vector.extract_strided_slice %5 {offsets = [0, 5], sizes = [12, 128], strides = [1, 1]} : vector<12x138xf32> to vector<12x128xf32>
    %c60 = arith.constant 60 : index
    %c0_8 = arith.constant 0 : index
    %17 = vector.load %arg7[%c60, %c0_8] : memref<132x128xf32, #tpu.memory_space<vmem>>, vector<12x128xf32>
    tpu.vector_store %arg7[%c60, %c0_8], %16 {strides = array<i32>} : memref<132x128xf32, #tpu.memory_space<vmem>>, vector<12x128xf32>,
    %18 = vector.extract_strided_slice %5 {offsets = [0, 6], sizes = [12, 128], strides = [1, 1]} : vector<12x138xf32> to vector<12x128xf32>
    %c72 = arith.constant 72 : index
    %c0_9 = arith.constant 0 : index
    %19 = vector.load %arg7[%c72, %c0_9] : memref<132x128xf32, #tpu.memory_space<vmem>>, vector<12x128xf32>
    tpu.vector_store %arg7[%c72, %c0_9], %18 {strides = array<i32>} : memref<132x128xf32, #tpu.memory_space<vmem>>, vector<12x128xf32>,
    %20 = vector.extract_strided_slice %5 {offsets = [0, 7], sizes = [12, 128], strides = [1, 1]} : vector<12x138xf32> to vector<12x128xf32>
    %c84 = arith.constant 84 : index
    %c0_10 = arith.constant 0 : index
    %21 = vector.load %arg7[%c84, %c0_10] : memref<132x128xf32, #tpu.memory_space<vmem>>, vector<12x128xf32>
    tpu.vector_store %arg7[%c84, %c0_10], %20 {strides = array<i32>} : memref<132x128xf32, #tpu.memory_space<vmem>>, vector<12x128xf32>,
    %22 = vector.extract_strided_slice %5 {offsets = [0, 8], sizes = [12, 128], strides = [1, 1]} : vector<12x138xf32> to vector<12x128xf32>
    %c96 = arith.constant 96 : index
    %c0_11 = arith.constant 0 : index
    %23 = vector.load %arg7[%c96, %c0_11] : memref<132x128xf32, #tpu.memory_space<vmem>>, vector<12x128xf32>
    tpu.vector_store %arg7[%c96, %c0_11], %22 {strides = array<i32>} : memref<132x128xf32, #tpu.memory_space<vmem>>, vector<12x128xf32>,
    %24 = vector.extract_strided_slice %5 {offsets = [0, 9], sizes = [12, 128], strides = [1, 1]} : vector<12x138xf32> to vector<12x128xf32>
    %c108 = arith.constant 108 : index
    %c0_12 = arith.constant 0 : index
    %25 = vector.load %arg7[%c108, %c0_12] : memref<132x128xf32, #tpu.memory_space<vmem>>, vector<12x128xf32>
    tpu.vector_store %arg7[%c108, %c0_12], %24 {strides = array<i32>} : memref<132x128xf32, #tpu.memory_space<vmem>>, vector<12x128xf32>,
    %26 = vector.extract_strided_slice %5 {offsets = [0, 10], sizes = [12, 128], strides = [1, 1]} : vector<12x138xf32> to vector<12x128xf32>
    %c120 = arith.constant 120 : index
    %c0_13 = arith.constant 0 : index
    %27 = vector.load %arg7[%c120, %c0_13] : memref<132x128xf32, #tpu.memory_space<vmem>>, vector<12x128xf32>
    tpu.vector_store %arg7[%c120, %c0_13], %26 {strides = array<i32>} : memref<132x128xf32, #tpu.memory_space<vmem>>, vector<12x128xf32>,
    %c0_14 = arith.constant 0 : index
    %c0_15 = arith.constant 0 : index
    %28 = vector.load %arg3[%c0_14, %c0_15] : memref<32x132xf32, #tpu.memory_space<vmem>>, vector<32x132xf32>
    %c0_16 = arith.constant 0 : index
    %c0_17 = arith.constant 0 : index
    %29 = vector.load %arg7[%c0_16, %c0_17] : memref<132x128xf32, #tpu.memory_space<vmem>>, vector<132x128xf32>
    %cst = arith.constant dense<0.000000e+00> : vector<32x128xf32>
    %30 = tpu.matmul %28, %29, %cst {dimension_numbers = #tpu.dot_dimension_numbers<[1], [0], [0], [1], [0, 0, 1, 1], [], []>} : vector<32x132xf32>, vector<132x128xf32>, vector<32x128xf32> -> vector<32x128xf32>
    %c0_18 = arith.constant 0 : index
    %c0_19 = arith.constant 0 : index
    %31 = vector.load %arg4[%c0_18, %c0_19] : memref<32x1xf32, #tpu.memory_space<vmem>>, vector<32x1xf32>
    %32 = vector.broadcast %31 : vector<32x1xf32> to vector<32x128xf32>
    %33 = arith.addf %30, %32 : vector<32x128xf32>
    %cst_20 = arith.constant 0.000000e+00 : f32
    %34 = vector.broadcast %cst_20 : f32 to vector<32x128xf32>
    %35 = arith.maximumf %33, %34 : vector<32x128xf32>
    %c0_21 = arith.constant 0 : index
    %c0_22 = arith.constant 0 : index
    %c0_23 = arith.constant 0 : index
    %36 = vector.load %arg5[%c0_21, %c0_22, %c0_23] : memref<1x32x128xf32, #tpu.memory_space<vmem>>, vector<1x32x128xf32>
    %37 = vector.shape_cast %36 : vector<1x32x128xf32> to vector<32x128xf32>
    %38 = vector.shape_cast %35 : vector<32x128xf32> to vector<1x32x128xf32>
    tpu.vector_store %arg5[%c0_21, %c0_22, %c0_23], %38 {strides = array<i32>} : memref<1x32x128xf32, #tpu.memory_space<vmem>>, vector<1x32x128xf32>,
    return
  }
  func.func @transform_0(%arg0: i32, %arg1: i32) -> (i32, i32, i32) {
    %c0_i32 = arith.constant 0 : i32
    %c0_i32_0 = arith.constant 0 : i32
    %c0_i32_1 = arith.constant 0 : i32
    return %arg0, %c0_i32, %c0_i32_0 : i32, i32, i32
  }
  func.func @transform_1(%arg0: i32, %arg1: i32) -> (i32, i32) {
    %c0_i32 = arith.constant 0 : i32
    %c0_i32_0 = arith.constant 0 : i32
    %c0_i32_1 = arith.constant 0 : i32
    return %c0_i32, %c0_i32_0 : i32, i32
  }
  func.func @transform_2(%arg0: i32, %arg1: i32) -> (i32, i32) {
    %c0_i32 = arith.constant 0 : i32
    %c0_i32_0 = arith.constant 0 : i32
    %c0_i32_1 = arith.constant 0 : i32
    return %c0_i32, %c0_i32_0 : i32, i32
  }
  func.func @transform_3(%arg0: i32, %arg1: i32) -> (i32, i32, i32) {
    %c0_i32 = arith.constant 0 : i32
    %c0_i32_0 = arith.constant 0 : i32
    return %arg0, %c0_i32, %arg1 : i32, i32, i32
  }
}

</mosaic_0001>

<bundles_post_ra>
// kernel: dilated_stride_embed.2
= control target key start
LH: loop header
LB: loop body
LE: loop exit
PB: predicated region body
PF: predicated region fallthrough
CT: control target
= control target key end

     0   :  { %s931_s12 = smov 0   ;;  %s933_s13 = smov 0   ;;  %s1159_s0 = inlined_call_operand.vmem [shape: f32[2,12,384], index: 0, kind: input, shape index: {}]   ;;  %s1160_s1 = inlined_call_operand.vmem [shape: f32[32,132], index: 1, kind: input, shape index: {}]   ;;  %s1161_s2 = inlined_call_operand.vmem [shape: f32[2,32,1], index: 2, kind: output, shape index: {0}]   ;;  %s1162_s3 = inlined_call_operand.vmem [shape: f32[2,32,1], index: 3, kind: output, shape index: {1}]  }
   0x1   :  { %s935_s14 = smov 0   ;;  %s937_s15 = smov 0  }
   0x2   :  { %s939_s16 = smov 0  }
   0x3 LB: > { %s23_s17 = sadd.s32 1, %s888_s14  ;;  %s26_s18 = sadd.s32 1, %s892_s15  ;;  %s896_s16 = sphi %s939_s16, %s14_s16   ;;  %s892_s15 = sphi %s937_s15, %s1166_s15   ;;  %s888_s14 = sphi %s935_s14, %s1165_s14   ;;  %s884_s13 = sphi %s933_s13, %s1164_s13   ;;  %s880_s12 = sphi %s931_s12, %s1163_s12  }
   0x4   : > { %p24_p0 = scmp.ge.s32.totalorder %s23_s17, 3  ;;  %p751_p1 = scmp.ge.s32.totalorder %s896_s16, 1 }
   0x5   : > { %p152_p2 = scmp.lt.s32.totalorder %s896_s16, 7 }
   0x6   : > { %s1168_s17 = smov (%p24_p0, %s23_s17), 0  ;;  %s1170_s18 = smov (!%p24_p0, %s26_s18), %s892_s15 }
   0x7   : > { %p153_p3 = pnand %p751_p1, %p152_p2  ;;  %p28_p4 = scmp.ge.s32.totalorder %s1170_s18, 2 }
   0x8   : > { %p181_p5 = scmp.lt.s32.totalorder (!%p153_p3), %s884_s13, 1  ;;  %p757_p6 = scmp.ne.s32.totalorder (!%p153_p3), %s880_s12, 0 }
   0x9   : > { %s1172_s18 = smov (%p28_p4, %s1170_s18), 0  ;;  %156 = sbr.rel (%p153_p3) target bundleno = 721 (0x2d1), region = 28 }
   0xe   : > { %s1174_s13 = smov (!%p181_p5, %s884_s13), 1  ;;  %199 = sbr.rel (%p757_p6) target bundleno = 161 (0xa1), region = 32 }
   0xf   : > { %s804_s19 = smul.u32 48, %s1174_s13  ;;  %s767_s20 = sshll.u32 %s1174_s13, 5 }
  0x10   : > { %s966_s23 = scalar_lea.vmem %s1161_s2, %s767_s20  ;;  %s971_s26 = scalar_lea.vmem %s1162_s3, %s767_s20 }
  0x11   : > { %s976_s29 = scalar_lea.vmem %s1159_s0, %s804_s19  ;;  %s898_s30 = smov (!%p757_p6), 5  }
  0x13   : > { %v243_v0 = vld [vmem:[%s976_s29] sm:$0xff]  ;;  %vm209_vm0 = vcmask 39936   ;;  %vm200_vm1 = vcmask 7168   ;;  %v244_v1 = vld [vmem:[%s976_s29 + $0x18] sm:$0xf]  ;;  %v899_v3 = vmov 0.0  }
  0x14   : > { %247 = vrot.lane.b32.xlu1 %v243_v0, %s898_s30  ;;  %217 = vrot.lane.b32.xlu0 %v243_v0, %s898_s30  ;;  %v214_v2 = vld [vmem:[%s976_s29 + $0x18] sm:$0xf]  ;;  %201 = vst.msk [vmem:[%s966_s23] sm:$0xff] %vm200_vm1, %v899_v3  ;;  %vm211_vm2 = vcmask 35840   ;;  %vm223_vm3 = vcmask 1047592   ;;  %vm226_vm4 = vcmask 1043496  }
  0x15   : > { %202 = vst.msk [vmem:[%s966_s23 + $0x8] sm:$0xff] %vm200_vm1, %v899_v3  ;;  %203 = vst.msk [vmem:[%s966_s23 + $0x10] sm:$0xff] %vm200_vm1, %v899_v3  ;;  %v257_v4 = vld [vmem:[%s976_s29 + $0x20] sm:$0xf]  ;;  %v256_v5 = vld [vmem:[%s976_s29 + $0x8] sm:$0xff]  ;;  %vm241_vm5 = vcmask 76840  }
  0x16   : > { %204 = vst.msk [vmem:[%s966_s23 + $0x18] sm:$0xff] %vm200_vm1, %v899_v3  ;;  %205 = vst.msk [vmem:[%s971_s26] sm:$0xff] %vm200_vm1, %v899_v3  ;;  %v283_v6 = vld [vmem:[%s976_s29 + $0x20] sm:$0xf]  ;;  %v296_v7 = vld [vmem:[%s976_s29 + $0x28] sm:$0xf] }
  0x17   : > { %206 = vst.msk [vmem:[%s971_s26 + $0x8] sm:$0xff] %vm200_vm1, %v899_v3  ;;  %207 = vst.msk [vmem:[%s971_s26 + $0x10] sm:$0xff] %vm200_vm1, %v899_v3  ;;  %v295_v8 = vld [vmem:[%s976_s29 + $0x10] sm:$0xff]  ;;  %v230_v9 = vld [vmem:[%s976_s29 + $0x20] sm:$0xf]  ;;  %vm239_vm6 = vcmask 80936  }
  0x18   : > { %208 = vst.msk [vmem:[%s971_s26 + $0x18] sm:$0xff] %vm200_vm1, %v899_v3  ;;  %249 = vrot.lane.b32.xlu1 %v244_v1, %s898_s30  ;;  %219 = vrot.lane.b32.xlu0 %v214_v2, %s898_s30  ;;  %v271_v10 = vld [vmem:[%s976_s29 + $0x28] sm:$0xf] }
  0x19   : > { %210 = vst.msk [vmem:[#allocation2] sm:$0xff] %vm209_vm0, %v899_v3 }
  0x1a   : > { %212 = vst.msk [vmem:[#allocation2 + $0x10] sm:$0xf] %vm211_vm2, %v899_v3 }
  0x1c   : > { %262 = vrot.lane.b32.xlu1 %v257_v4, %s898_s30  ;;  %260 = vrot.lane.b32.xlu0 %v256_v5, %s898_s30 }
  0x20   : > { %288 = vrot.lane.b32.xlu1 %v283_v6, %s898_s30  ;;  %286 = vrot.lane.b32.xlu0 %v256_v5, %s898_s30 }
  0x24   : > { %301 = vrot.lane.b32.xlu1 %v296_v7, %s898_s30  ;;  %299 = vrot.lane.b32.xlu0 %v295_v8, %s898_s30 }
  0x28   : > { %235 = vrot.lane.b32.xlu1 %v230_v9, %s898_s30  ;;  %233 = vrot.lane.b32.xlu0 %v256_v5, %s898_s30 }
  0x2c   : > { %276 = vrot.lane.b32.xlu1 %v271_v10, %s898_s30  ;;  %274 = vrot.lane.b32.xlu0 %v295_v8, %s898_s30 }
  0x86   : > { %v248_v11 = vpop.permute.xlu1 %247  ;;  %v218_v12 = vpop.permute.xlu0 %217 }
  0x87   : > { %254 = vst.msk [vmem:[#allocation2 + $0x20] sm:$0xff] %vm209_vm0, %v248_v11  ;;  %225 = vst.msk [vmem:[#allocation2 + $0x8] sm:$0xff] %vm209_vm0, %v218_v12 }
  0x88   : > { %224 = vst.msk [vmem:[#allocation2] sm:$0xff] %vm223_vm3, %v218_v12 }
  0x8a   : > { %v250_v13 = vpop.permute.xlu1 %249  ;;  %v220_v14 = vpop.permute.xlu0 %219 }
  0x8b   : > { %255 = vst.msk [vmem:[#allocation2 + $0x30] sm:$0xf] %vm211_vm2, %v250_v13  ;;  %228 = vst.msk [vmem:[#allocation2 + $0x18] sm:$0xf] %vm211_vm2, %v220_v14 }
  0x8c   : > { %227 = vst.msk [vmem:[#allocation2 + $0x10] sm:$0xf] %vm226_vm4, %v220_v14 }
  0x8e   : > { %v263_v15 = vpop.permute.xlu1 %262  ;;  %v261_v16 = vpop.permute.xlu0 %260 }
  0x8f   : > { %268 = vst.msk [vmem:[#allocation2 + $0x30] sm:$0xf] %vm226_vm4, %v263_v15 }
  0x90   : > { %269 = vst.msk [vmem:[#allocation2 + $0x38] sm:$0xf] %vm211_vm2, %v263_v15 }
  0x91   : > { %266 = vst.msk [vmem:[#allocation2 + $0x20] sm:$0xff] %vm223_vm3, %v261_v16 }
  0x92   : > { %267 = vst.msk [vmem:[#allocation2 + $0x28] sm:$0xff] %vm209_vm0, %v261_v16  ;;  %v289_v17 = vpop.permute.xlu1 %288  ;;  %v287_v18 = vpop.permute.xlu0 %286 }
  0x93   : > { %294 = vst.msk [vmem:[#allocation2 + $0x50] sm:$0xf] %vm211_vm2, %v289_v17 }
  0x94   : > { %293 = vst.msk [vmem:[#allocation2 + $0x40] sm:$0xff] %vm209_vm0, %v287_v18 }
  0x96   : > { %v302_v19 = vpop.permute.xlu1 %301  ;;  %v300_v20 = vpop.permute.xlu0 %299 }
  0x97   : > { %307 = vst.msk [vmem:[#allocation2 + $0x50] sm:$0xf] %vm226_vm4, %v302_v19 }
  0x98   : > { %308 = vst.msk [vmem:[#allocation2 + $0x58] sm:$0xf] %vm211_vm2, %v302_v19 }
  0x99   : > { %305 = vst.msk [vmem:[#allocation2 + $0x40] sm:$0xff] %vm223_vm3, %v300_v20 }
  0x9a   : > { %306 = vst.msk [vmem:[#allocation2 + $0x48] sm:$0xff] %vm209_vm0, %v300_v20  ;;  %v236_v21 = vpop.permute.xlu1 %235  ;;  %v234_v22 = vpop.permute.xlu0 %233 }
  0x9b   : > { %310 = vst.msk [vmem:[#allocation2 + $0x58] sm:$0xf] %vm241_vm5, %v899_v3  ;;  %242 = vst.msk [vmem:[#allocation2 + $0x18] sm:$0xf] %vm241_vm5, %v236_v21 }
  0x9c   : > { %309 = vst.msk [vmem:[#allocation2 + $0x48] sm:$0xff] %vm239_vm6, %v899_v3  ;;  %240 = vst.msk [vmem:[#allocation2 + $0x8] sm:$0xff] %vm239_vm6, %v234_v22 }
  0x9e   : > { %v277_v23 = vpop.permute.xlu1 %276  ;;  %v275_v24 = vpop.permute.xlu0 %274 }
  0x9f   : > { %281 = vst.msk [vmem:[#allocation2 + $0x38] sm:$0xf] %vm241_vm5, %v277_v23 }
  0xa0   : > { %280 = vst.msk [vmem:[#allocation2 + $0x28] sm:$0xff] %vm239_vm6, %v275_v24 }
  0xa1 PF: > { %s769_s4 = sshll.u32 %s880_s12, 5  ;;  %v900_v25 = vmov 0.0   ;;  %s901_s6 = smov 119   ;;  %v475_v30 = vld [vmem:[%s1160_s1 + $0x8] sm:$0xff]  ;;  %vm499_vm7 = vcmask 31744   ;;  %vm452_vm8 = vcmask 973824  }
  0xa2   : > { %516 = vmatprep.subr.mxu0 %v900_v25  ;;  %770 = vmatprep.subr.mxu1 %v900_v25  ;;  %s313_s5 = scalar_lea.vmem [#allocation2], %s769_s4  ;;  %s902_s7 = smov 118   ;;  %v479_v31 = vld [vmem:[%s1160_s1 + $0x28] sm:$0xff]  ;;  %vm467_vm9 = vcmask 965632   ;;  %vm437_vm10 = vcmask 982016   ;;  %vm422_vm11 = vcmask 990208  }
  0xa3   : > { %s903_s8 = smov 120   ;;  %s904_s9 = smov 121   ;;  %761 = vmatprep.mubr.msk.f32.mxu0 %vm499_vm7, %v475_v30  ;;  %763 = vmatprep.mubr.msk.f32.mxu1 %vm499_vm7, %v479_v31  ;;  %vm407_vm12 = vcmask 998400   ;;  %vm392_vm13 = vcmask 1006592   ;;  %vm377_vm14 = vcmask 1014784   ;;  %vm362_vm15 = vcmask 1022976  }
  0xa4   : > { %s905_s10 = smov 122   ;;  %s906_s11 = smov 123   ;;  %vm347_vm0 = vcmask 1031168   ;;  %vm332_vm1 = vcmask 1039360   ;;  %vm512_vm2 = vcmask 1043456   ;;  %vm617_vm3 = vcmask 7168  }
  0xa5   : > { %s907_s12 = smov 124   ;;  %s908_s13 = smov 125  }
  0xa6   : > { %s909_s19 = smov 126   ;;  %s910_s20 = smov 127  }
  0xa7   : > { %v1032_v26 = vld [vmem:[%s313_s5] sm:$0xff]  ;;  %v316_v27 = vld [vmem:[%s313_s5 + $0x10] sm:$0xf]  ;;  %v315_v28 = vld [vmem:[%s313_s5 + $0x8] sm:$0xff] }
  0xa8   : > { %444 = vrot.lane.b32.xlu1 %v1032_v26, %s901_s6  ;;  %459 = vrot.lane.b32.xlu0 %v1032_v26, %s902_s7  ;;  %319 = vst [vmem:[#allocation3 + $0x8] sm:$0xf] %v316_v27  ;;  %v317_v29 = vld [vmem:[%s313_s5 + $0x18] sm:$0xf] }
  0xac   : > { %446 = vrot.lane.b32.xlu1 %v315_v28, %s901_s6  ;;  %461 = vrot.lane.b32.xlu0 %v315_v28, %s902_s7 }
  0xb0   : > { %450 = vrot.lane.b32.xlu1 %v317_v29, %s901_s6  ;;  %448 = vrot.lane.b32.xlu0 %v316_v27, %s901_s6 }
  0xb4   : > { %435 = vrot.lane.b32.xlu1 %v317_v29, %s903_s8  ;;  %433 = vrot.lane.b32.xlu0 %v316_v27, %s903_s8 }
  0xb8   : > { %431 = vrot.lane.b32.xlu1 %v315_v28, %s903_s8  ;;  %429 = vrot.lane.b32.xlu0 %v1032_v26, %s903_s8 }
  0xbc   : > { %416 = vrot.lane.b32.xlu1 %v315_v28, %s904_s9  ;;  %414 = vrot.lane.b32.xlu0 %v1032_v26, %s904_s9 }
  0xc0   : > { %420 = vrot.lane.b32.xlu1 %v317_v29, %s904_s9  ;;  %418 = vrot.lane.b32.xlu0 %v316_v27, %s904_s9 }
  0xc4   : > { %405 = vrot.lane.b32.xlu1 %v317_v29, %s905_s10  ;;  %403 = vrot.lane.b32.xlu0 %v316_v27, %s905_s10 }
  0xc8   : > { %401 = vrot.lane.b32.xlu1 %v315_v28, %s905_s10  ;;  %399 = vrot.lane.b32.xlu0 %v1032_v26, %s905_s10 }
  0xcc   : > { %386 = vrot.lane.b32.xlu1 %v315_v28, %s906_s11  ;;  %384 = vrot.lane.b32.xlu0 %v1032_v26, %s906_s11 }
  0xd0   : > { %390 = vrot.lane.b32.xlu1 %v317_v29, %s906_s11  ;;  %388 = vrot.lane.b32.xlu0 %v316_v27, %s906_s11 }
  0xd4   : > { %375 = vrot.lane.b32.xlu1 %v317_v29, %s907_s12  ;;  %373 = vrot.lane.b32.xlu0 %v316_v27, %s907_s12 }
  0xd8   : > { %371 = vrot.lane.b32.xlu1 %v315_v28, %s907_s12  ;;  %369 = vrot.lane.b32.xlu0 %v1032_v26, %s907_s12 }
  0xdc   : > { %356 = vrot.lane.b32.xlu1 %v315_v28, %s908_s13  ;;  %354 = vrot.lane.b32.xlu0 %v1032_v26, %s908_s13 }
  0xe0   : > { %360 = vrot.lane.b32.xlu1 %v317_v29, %s908_s13  ;;  %358 = vrot.lane.b32.xlu0 %v316_v27, %s908_s13 }
  0xe4   : > { %345 = vrot.lane.b32.xlu1 %v317_v29, %s909_s19  ;;  %343 = vrot.lane.b32.xlu0 %v316_v27, %s909_s19 }
  0xe8   : > { %341 = vrot.lane.b32.xlu1 %v315_v28, %s909_s19  ;;  %339 = vrot.lane.b32.xlu0 %v1032_v26, %s909_s19 }
  0xec   : > { %326 = vrot.lane.b32.xlu1 %v315_v28, %s910_s20  ;;  %324 = vrot.lane.b32.xlu0 %v1032_v26, %s910_s20 }
  0xf0   : > { %330 = vrot.lane.b32.xlu1 %v317_v29, %s910_s20  ;;  %328 = vrot.lane.b32.xlu0 %v316_v27, %s910_s20 }
  0xf4   : > { %465 = vrot.lane.b32.xlu1 %v317_v29, %s902_s7  ;;  %463 = vrot.lane.b32.xlu0 %v316_v27, %s902_s7 }
 0x11a   : > { %v445_v32 = vpop.permute.xlu1 %444  ;;  %v460_v33 = vpop.permute.xlu0 %459 }
 0x11e   : > { %v447_v34 = vpop.permute.xlu1 %446  ;;  %v462_v35 = vpop.permute.xlu0 %461 }
 0x11f   : > { %v453_v36 = vsel %vm452_vm8, %v445_v32, %v447_v34  ;;  %v468_v37 = vsel %vm467_vm9, %v460_v33, %v462_v35 }
 0x120   : > { %457 = vst [vmem:[#allocation3 + $0x6c] sm:$0xff] %v453_v36  ;;  %517 = vmatpush1.msra.mxu0 %v468_v37  ;;  %787 = vmatpush1.msra.mxu1 %v468_v37 }
 0x121   : > { %518 = vmatprep.subr.mxu0 %v900_v25  ;;  %771 = vmatprep.subr.mxu1 %v900_v25 }
 0x122   : > { %v451_v38 = vpop.permute.xlu1 %450  ;;  %v449_v39 = vpop.permute.xlu0 %448 }
 0x123   : > { %v454_v40 = vsel %vm452_vm8, %v449_v39, %v451_v38 }
 0x124   : > { %458 = vst [vmem:[#allocation3 + $0x74] sm:$0xf] %v454_v40 }
 0x126   : > { %v436_v41 = vpop.permute.xlu1 %435  ;;  %v434_v42 = vpop.permute.xlu0 %433 }
 0x127   : > { %v439_v43 = vsel %vm437_vm10, %v434_v42, %v436_v41  ;;  %v474_v41 = vld [vmem:[%s1160_s1] sm:$0xff] }
 0x128   : > { %443 = vst [vmem:[#allocation3 + $0x68] sm:$0xf] %v439_v43  ;;  %v478_v42 = vld [vmem:[%s1160_s1 + $0x20] sm:$0xff]  ;;  %v477_v43 = vld [vmem:[%s1160_s1 + $0x18] sm:$0xff] }
 0x12a   : > { %v432_v44 = vpop.permute.xlu1 %431  ;;  %v430_v45 = vpop.permute.xlu0 %429 }
 0x12b   : > { %v438_v46 = vsel %vm437_vm10, %v430_v45, %v432_v44  ;;  %v496_v47 = vld [vmem:[#allocation3 + $0x70] sm:$0xff] }
 0x12c   : > { %519 = vmatpush1.msra.mxu0 %v496_v47  ;;  %788 = vmatpush1.msra.mxu1 %v496_v47  ;;  %v480_v44 = vld [vmem:[%s1160_s1 + $0x30] sm:$0xff] }
 0x12d   : > { %520 = vmatprep.subr.mxu0 %v900_v25  ;;  %772 = vmatprep.subr.mxu1 %v900_v25 }
 0x12e   : > { %v417_v48 = vpop.permute.xlu1 %416  ;;  %v415_v49 = vpop.permute.xlu0 %414 }
 0x12f   : > { %v423_v50 = vsel %vm422_vm11, %v415_v49, %v417_v48  ;;  %v495_v51 = vld [vmem:[#allocation3 + $0x68] sm:$0xff] }
 0x130   : > { %427 = vst [vmem:[#allocation3 + $0x54] sm:$0xff] %v423_v50  ;;  %521 = vmatpush1.msra.mxu0 %v495_v51  ;;  %789 = vmatpush1.msra.mxu1 %v495_v51 }
 0x131   : > { %522 = vmatprep.subr.mxu0 %v900_v25  ;;  %773 = vmatprep.subr.mxu1 %v900_v25 }
 0x132   : > { %v421_v52 = vpop.permute.xlu1 %420  ;;  %v419_v53 = vpop.permute.xlu0 %418  ;;  %523 = vmatpush1.msra.mxu0 %v438_v46  ;;  %790 = vmatpush1.msra.mxu1 %v438_v46 }
 0x133   : > { %v424_v54 = vsel %vm422_vm11, %v419_v53, %v421_v52  ;;  %524 = vmatprep.subr.mxu0 %v900_v25  ;;  %774 = vmatprep.subr.mxu1 %v900_v25 }
 0x134   : > { %428 = vst [vmem:[#allocation3 + $0x5c] sm:$0xf] %v424_v54 }
 0x136   : > { %v406_v55 = vpop.permute.xlu1 %405  ;;  %v404_v56 = vpop.permute.xlu0 %403 }
 0x137   : > { %v409_v57 = vsel %vm407_vm12, %v404_v56, %v406_v55 }
 0x138   : > { %413 = vst [vmem:[#allocation3 + $0x50] sm:$0xf] %v409_v57  ;;  %v601_v57 = vld [vmem:[%s966_s23] sm:$0xff] }
 0x13a   : > { %v402_v58 = vpop.permute.xlu1 %401  ;;  %v400_v59 = vpop.permute.xlu0 %399 }
 0x13b   : > { %v408_v60 = vsel %vm407_vm12, %v400_v59, %v402_v58  ;;  %v493_v61 = vld [vmem:[#allocation3 + $0x58] sm:$0xff]  ;;  %v622_v59 = vld [vmem:[%s971_s26] sm:$0xff] }
 0x13c   : > { %525 = vmatpush1.msra.mxu0 %v493_v61  ;;  %791 = vmatpush1.msra.mxu1 %v493_v61 }
 0x13d   : > { %526 = vmatprep.subr.mxu0 %v900_v25  ;;  %775 = vmatprep.subr.mxu1 %v900_v25 }
 0x13e   : > { %v387_v62 = vpop.permute.xlu1 %386  ;;  %v385_v63 = vpop.permute.xlu0 %384 }
 0x13f   : > { %v393_v0 = vsel %vm392_vm13, %v385_v63, %v387_v62  ;;  %v492_v1 = vld [vmem:[#allocation3 + $0x50] sm:$0xff] }
 0x140   : > { %397 = vst [vmem:[#allocation3 + $0x3c] sm:$0xff] %v393_v0  ;;  %527 = vmatpush1.msra.mxu0 %v492_v1  ;;  %792 = vmatpush1.msra.mxu1 %v492_v1  ;;  %v603_v62 = vld [vmem:[%s966_s23 + $0x10] sm:$0xff]  ;;  %v602_v1 = vld [vmem:[%s966_s23 + $0x8] sm:$0xff] }
 0x141   : > { %528 = vmatprep.subr.mxu0 %v900_v25  ;;  %776 = vmatprep.subr.mxu1 %v900_v25 }
 0x142   : > { %v391_v2 = vpop.permute.xlu1 %390  ;;  %v389_v3 = vpop.permute.xlu0 %388  ;;  %529 = vmatpush1.msra.mxu0 %v408_v60  ;;  %793 = vmatpush1.msra.mxu1 %v408_v60 }
 0x143   : > { %v394_v4 = vsel %vm392_vm13, %v389_v3, %v391_v2  ;;  %530 = vmatprep.subr.mxu0 %v900_v25  ;;  %777 = vmatprep.subr.mxu1 %v900_v25 }
 0x144   : > { %398 = vst [vmem:[#allocation3 + $0x44] sm:$0xf] %v394_v4  ;;  %v604_v4 = vld [vmem:[%s966_s23 + $0x18] sm:$0xff] }
 0x146   : > { %v376_v5 = vpop.permute.xlu1 %375  ;;  %v374_v6 = vpop.permute.xlu0 %373 }
 0x147   : > { %v379_v7 = vsel %vm377_vm14, %v374_v6, %v376_v5 }
 0x148   : > { %383 = vst [vmem:[#allocation3 + $0x38] sm:$0xf] %v379_v7  ;;  %v624_v7 = vld [vmem:[%s971_s26 + $0x10] sm:$0xff] }
 0x14a   : > { %v372_v8 = vpop.permute.xlu1 %371  ;;  %v370_v9 = vpop.permute.xlu0 %369 }
 0x14b   : > { %v378_v10 = vsel %vm377_vm14, %v370_v9, %v372_v8  ;;  %v490_v11 = vld [vmem:[#allocation3 + $0x40] sm:$0xff] }
 0x14c   : > { %531 = vmatpush1.msra.mxu0 %v490_v11  ;;  %794 = vmatpush1.msra.mxu1 %v490_v11 }
 0x14d   : > { %532 = vmatprep.subr.mxu0 %v900_v25  ;;  %778 = vmatprep.subr.mxu1 %v900_v25 }
 0x14e   : > { %v357_v12 = vpop.permute.xlu1 %356  ;;  %v355_v13 = vpop.permute.xlu0 %354 }
 0x14f   : > { %v363_v14 = vsel %vm362_vm15, %v355_v13, %v357_v12  ;;  %v489_v15 = vld [vmem:[#allocation3 + $0x38] sm:$0xff] }
 0x150   : > { %367 = vst [vmem:[#allocation3 + $0x24] sm:$0xff] %v363_v14  ;;  %533 = vmatpush1.msra.mxu0 %v489_v15  ;;  %795 = vmatpush1.msra.mxu1 %v489_v15  ;;  %v625_v14 = vld [vmem:[%s971_s26 + $0x18] sm:$0xff] }
 0x151   : > { %534 = vmatprep.subr.mxu0 %v900_v25  ;;  %779 = vmatprep.subr.mxu1 %v900_v25 }
 0x152   : > { %v361_v16 = vpop.permute.xlu1 %360  ;;  %v359_v17 = vpop.permute.xlu0 %358  ;;  %535 = vmatpush1.msra.mxu0 %v378_v10  ;;  %796 = vmatpush1.msra.mxu1 %v378_v10  ;;  %v623_v10 = vld [vmem:[%s971_s26 + $0x8] sm:$0xff] }
 0x153   : > { %v364_v18 = vsel %vm362_vm15, %v359_v17, %v361_v16  ;;  %536 = vmatprep.subr.mxu0 %v900_v25  ;;  %780 = vmatprep.subr.mxu1 %v900_v25 }
 0x154   : > { %368 = vst [vmem:[#allocation3 + $0x2c] sm:$0xf] %v364_v18 }
 0x156   : > { %v346_v19 = vpop.permute.xlu1 %345  ;;  %v344_v20 = vpop.permute.xlu0 %343 }
 0x157   : > { %v349_v21 = vsel %vm347_vm0, %v344_v20, %v346_v19 }
 0x158   : > { %353 = vst [vmem:[#allocation3 + $0x20] sm:$0xf] %v349_v21 }
 0x15a   : > { %v342_v22 = vpop.permute.xlu1 %341  ;;  %v340_v23 = vpop.permute.xlu0 %339 }
 0x15b   : > { %v348_v24 = vsel %vm347_vm0, %v340_v23, %v342_v22  ;;  %v487_v27 = vld [vmem:[#allocation3 + $0x28] sm:$0xff] }
 0x15c   : > { %537 = vmatpush1.msra.mxu0 %v487_v27  ;;  %797 = vmatpush1.msra.mxu1 %v487_v27 }
 0x15d   : > { %538 = vmatprep.subr.mxu0 %v900_v25  ;;  %781 = vmatprep.subr.mxu1 %v900_v25 }
 0x15e   : > { %v327_v28 = vpop.permute.xlu1 %326  ;;  %v325_v29 = vpop.permute.xlu0 %324 }
 0x15f   : > { %v333_v30 = vsel %vm332_vm1, %v325_v29, %v327_v28  ;;  %v486_v31 = vld [vmem:[#allocation3 + $0x20] sm:$0xff] }
 0x160   : > { %337 = vst [vmem:[#allocation3 + $0xc] sm:$0xff] %v333_v30  ;;  %539 = vmatpush1.msra.mxu0 %v486_v31  ;;  %798 = vmatpush1.msra.mxu1 %v486_v31 }
 0x161   : > { %540 = vmatprep.subr.mxu0 %v900_v25  ;;  %782 = vmatprep.subr.mxu1 %v900_v25 }
 0x162   : > { %v331_v32 = vpop.permute.xlu1 %330  ;;  %v329_v33 = vpop.permute.xlu0 %328  ;;  %541 = vmatpush1.msra.mxu0 %v348_v24  ;;  %799 = vmatpush1.msra.mxu1 %v348_v24 }
 0x163   : > { %v334_v34 = vsel %vm332_vm1, %v329_v33, %v331_v32  ;;  %542 = vmatprep.subr.mxu0 %v900_v25  ;;  %783 = vmatprep.subr.mxu1 %v900_v25 }
 0x164   : > { %338 = vst [vmem:[#allocation3 + $0x14] sm:$0xf] %v334_v34 }
 0x166   : > { %v466_v35 = vpop.permute.xlu1 %465  ;;  %v464_v36 = vpop.permute.xlu0 %463 }
 0x167   : > { %v469_v37 = vsel %vm467_vm9, %v464_v36, %v466_v35  ;;  %v483_v39 = vld [vmem:[#allocation3 + $0x8] sm:$0xff] }
 0x168   : > { %473 = vst [vmem:[#allocation3 + $0x80] sm:$0xf] %v469_v37 }
 0x16b   : > { %v484_v38 = vld [vmem:[#allocation3 + $0x10] sm:$0xff] }
 0x16c   : > { %543 = vmatpush1.msra.mxu0 %v484_v38  ;;  %800 = vmatpush1.msra.mxu1 %v484_v38 }
 0x16d   : > { %544 = vmatprep.subr.mxu0 %v900_v25  ;;  %784 = vmatprep.subr.mxu1 %v900_v25 }
 0x16e   : > { %545 = vmatpush1.msra.mxu0 %v483_v39  ;;  %801 = vmatpush1.msra.mxu1 %v483_v39 }
 0x16f   : > { %546 = vmatprep.subr.mxu0 %v900_v25  ;;  %785 = vmatprep.subr.mxu1 %v900_v25  ;;  %v498_v40 = vld [vmem:[#allocation3 + $0x80] sm:$0xf] }
 0x170   : > { %547 = vmatpush1.msra.mxu0 %v1032_v26  ;;  %802 = vmatpush1.msra.mxu1 %v1032_v26  ;;  %v481_v26 = vld [vmem:[%s1160_s1 + $0x38] sm:$0xff] }
 0x171   : > { %578 = vmatprep.subr.mxu0 %v900_v25  ;;  %786 = vmatprep.subr.mxu1 %v900_v25  ;;  %v476_v25 = vld [vmem:[%s1160_s1 + $0x10] sm:$0xff] }
 0x172   : > { %760 = vmatpush2.msk.msra.mxu0 %vm512_vm2, %v498_v40  ;;  %803 = vmatpush2.msk.msra.mxu1 %vm512_vm2, %v498_v40 }
 0x173   : > { %581 = vmatmul.mubr.f32.vlgmr.msra.gmra.mxu0 %v474_v41  ;;  %591 = vmatmul.mubr.f32.vlgmr.msra.gmra.mxu1 %v478_v42 }
 0x174   : > { %762 = vmatprep.mubr.msk.f32.mxu0 %vm499_vm7, %v477_v43  ;;  %764 = vmatprep.mubr.msk.f32.mxu1 %vm499_vm7, %v481_v26 }
 0x177   : > { %586 = vmatmul.mubr.f32.gmra.mxu0 %v476_v25  ;;  %596 = vmatmul.mubr.f32.gmra.mxu1 %v480_v44 }
 0x233   : > { %v582_v45 = vpop.f32.mrf.mxu0  ;;  %v592_v46 = vpop.f32.mrf.mxu1 }
 0x234   : > { %605 = vadd.xlane.f32.xlu0 %v582_v45  ;;  %v626_v47 = vmul.f32 %v582_v45, %v582_v45  ;;  %v628_v54 = vmul.f32 %v592_v46, %v592_v46 }
 0x235   : > { %v584_v48 = vpop.f32.mrf.mxu0  ;;  %v594_v49 = vpop.f32.mrf.mxu1 }
 0x236   : > { %630 = vadd.xlane.f32.xlu1 %v626_v47 }
 0x237   : > { %v587_v50 = vpop.f32.mrf.mxu0  ;;  %v597_v51 = vpop.f32.mrf.mxu1 }
 0x238   : > { %609 = vadd.xlane.f32.xlu0 %v592_v46  ;;  %v627_v55 = vmul.f32 %v587_v50, %v587_v50  ;;  %v629_v56 = vmul.f32 %v597_v51, %v597_v51 }
 0x239   : > { %v599_v52 = vpop.f32.mrf.mxu1  ;;  %v589_v53 = vpop.f32.mrf.mxu0 }
 0x23a   : > { %607 = vadd.xlane.f32.xlu1 %v587_v50 }
 0x23c   : > { %611 = vadd.xlane.f32.xlu0 %v597_v51 }
 0x23e   : > { %634 = vadd.xlane.f32.xlu1 %v628_v54 }
 0x240   : > { %632 = vadd.xlane.f32.xlu0 %v627_v55 }
 0x244   : > { %636 = vadd.xlane.f32.xlu0 %v629_v56 }
 0x2bd   : > { %v606_v58 = vpop.xlane.xlu0 %605 }
 0x2be   : > { %v613_v60 = vadd.f32 %v606_v58, %v601_v57 }
 0x2bf   : > { %v631_v61 = vpop.xlane.xlu1 %630 }
 0x2c0   : > { %618 = vst.msk [vmem:[%s966_s23] sm:$0xff] %vm617_vm3, %v613_v60  ;;  %v638_v63 = vadd.f32 %v631_v61, %v622_v59 }
 0x2c1   : > { %v610_v0 = vpop.xlane.xlu0 %609 }
 0x2c2   : > { %642 = vst.msk [vmem:[%s971_s26] sm:$0xff] %vm617_vm3, %v638_v63  ;;  %v615_v2 = vadd.f32 %v610_v0, %v603_v62 }
 0x2c3   : > { %v608_v3 = vpop.xlane.xlu1 %607 }
 0x2c4   : > { %620 = vst.msk [vmem:[%s966_s23 + $0x10] sm:$0xff] %vm617_vm3, %v615_v2  ;;  %v614_v5 = vadd.f32 %v608_v3, %v602_v1 }
 0x2c5   : > { %v612_v6 = vpop.xlane.xlu0 %611 }
 0x2c6   : > { %619 = vst.msk [vmem:[%s966_s23 + $0x8] sm:$0xff] %vm617_vm3, %v614_v5  ;;  %v616_v8 = vadd.f32 %v612_v6, %v604_v4 }
 0x2c7   : > { %v635_v9 = vpop.xlane.xlu1 %634 }
 0x2c8   : > { %621 = vst.msk [vmem:[%s966_s23 + $0x18] sm:$0xff] %vm617_vm3, %v616_v8  ;;  %v640_v11 = vadd.f32 %v635_v9, %v624_v7 }
 0x2c9   : > { %v633_v12 = vpop.xlane.xlu0 %632 }
 0x2ca   : > { %644 = vst.msk [vmem:[%s971_s26 + $0x10] sm:$0xff] %vm617_vm3, %v640_v11  ;;  %v639_v13 = vadd.f32 %v633_v12, %v623_v10 }
 0x2cc   : > { %643 = vst.msk [vmem:[%s971_s26 + $0x8] sm:$0xff] %vm617_vm3, %v639_v13 }
 0x2cd   : > { %v637_v15 = vpop.xlane.xlu0 %636 }
 0x2ce   : > { %v641_v16 = vadd.f32 %v637_v15, %v625_v14 }
 0x2d0   : > { %645 = vst.msk [vmem:[%s971_s26 + $0x18] sm:$0xff] %vm617_vm3, %v641_v16 }
 0x2d1 PF: > { %s14_s16 = sadd.s32 1, %s896_s16   ;;  %s1163_s12 = smov %s888_s14 }
 0x2d2   : > { %p11_p7 = scmp.ge.s32.totalorder %s14_s16, 8   ;;  %s1164_s13 = smov %s892_s15 }
 0x2d3   : > { %s1165_s14 = smov %s1168_s17  ;;  %s1166_s15 = smov %s1172_s18 }
 0x2d4   :  { %13 = sbr.rel (!%p11_p7) target bundleno = 3 (0x3), region = 77 }

// kernel: dilated_stride_embed.3
= control target key start
LH: loop header
LB: loop body
LE: loop exit
PB: predicated region body
PF: predicated region fallthrough
CT: control target
= control target key end

     0   :  { %8 = vsyncpa [#allocation5], 0  ;;  %s1263_s0 = inlined_call_operand.vmem [shape: f32[2,12,384], index: 0, kind: input, shape index: {}]   ;;  %s1264_s1 = inlined_call_operand.vmem [shape: f32[32,132], index: 1, kind: input, shape index: {}]   ;;  %s1265_s2 = inlined_call_operand.vmem [shape: f32[32,1], index: 2, kind: input, shape index: {}]   ;;  %s1266_s3 = inlined_call_operand.hbm [shape: f32[2,32,384], index: 3, kind: output, shape index: {}]  }
   0x1   :  { %10 = vsyncpa [#allocation5 + $0x1], 0  ;;  %s981_s12 = smov 0   ;;  %s983_s13 = smov 0  }
   0x2   :  { %s985_s14 = smov 0   ;;  %s987_s15 = smov 0  }
   0x3   :  { %s989_s16 = smov 0   ;;  %s991_s17 = smov 0  }
   0x4   :  { %s993_s18 = smov 0   ;;  %s995_s19 = smov 0  }
   0x5 LB: > { %s703_s20 = sadd.s32 4294967295, %s941_s19   ;;  %s704_s21 = sadd.s32 4294967294, %s941_s19   ;;  %s941_s19 = sphi %s995_s19, %s16_s19   ;;  %s937_s18 = sphi %s993_s18, %s1275_s18   ;;  %s933_s17 = sphi %s991_s17, %s1274_s17   ;;  %s929_s16 = sphi %s989_s16, %s1273_s16   ;;  %s925_s15 = sphi %s987_s15, %s1272_s15   ;;  %s921_s14 = sphi %s985_s14, %s1271_s14   ;;  %s917_s13 = sphi %s983_s13, %s1270_s13   ;;  %s913_s12 = sphi %s981_s12, %s1269_s12  }
   0x6   : > { %s25_s22 = sadd.s32 1, %s933_s17  ;;  %s28_s23 = sadd.s32 1, %s937_s18 }
   0x7   : > { %p26_p0 = scmp.ge.s32.totalorder %s25_s22, 3  ;;  %p115_p1 = scmp.ne.s32.totalorder %s921_s14, %s917_s13 }
   0x8   : > { %p116_p2 = scmp.eq.s32.totalorder %s703_s20, 5  ;;  %p121_p5 = scmp.ne.s32.totalorder %s917_s13, %s913_s12 }
   0x9   : > { %s1277_s22 = smov (%p26_p0, %s25_s22), 0  ;;  %s1279_s23 = smov (!%p26_p0, %s28_s23), %s937_s18 }
   0xa   : > { %s101_s24 = ssub.s32 %s933_s17, %s1277_s22  ;;  %p1032_p3 = por %p116_p2, %p115_p1 }
   0xb   : > { %p30_p4 = scmp.ge.s32.totalorder %s1279_s23, 2  ;;  %p122_p6 = scmp.eq.s32.totalorder %s704_s21, 5 }
   0xc   : > { %p707_p7 = scmp.ge.s32.totalorder %s941_s19, 1  ;;  %p154_p9 = scmp.lt.s32.totalorder %s941_s19, 7 }
   0xd   : > { %s1281_s23 = smov (%p30_p4, %s1279_s23), 0  ;;  %p1041_p8 = por %p122_p6, %p121_p5 }
   0xe   : > { %s100_s27 = ssub.s32 %s937_s18, %s1281_s23  ;;  %s105_s28 = sadd.s32 1, %s921_s14 }
   0xf   : > { %s102_s29 = sor.u32 %s101_s24, %s100_s27  ;;  %p155_p10 = pnand %p707_p7, %p154_p9 }
  0x10   : > { %p103_p11 = scmp.eq.s32.totalorder %s102_s29, 0  ;;  %s175_s4 = sand.u32 (!%p155_p10), 1, %s917_s13  }
  0x11   : > { %158 = sbr.rel (%p155_p10) target bundleno = 596 (0x254), region = 32  ;;  %p178_p12 = scmp.lt.s32.totalorder (!%p155_p10), %s929_s16, 1 }
  0x12   : > { %s1050_s30 = scalar_select %p103_p11, %s921_s14, %s105_s28  }
  0x13   : > { %s708_s5 = sshll.u32 (!%p155_p10), %s175_s4, 5  ;;  %p710_p13 = scmp.ne.s32.totalorder (!%p155_p10), %s925_s15, 0 }
  0x14   : > { %s1062_s11 = scalar_lea.vmem (!%p155_p10), [#allocation4], %s708_s5 }
  0x16   : > { %s179_s6 = scalar_select %p178_p12, %s929_s16, 1 }
  0x17   : > { %186 = sbr.rel (%p710_p13) target bundleno = 170 (0xaa), region = 36  ;;  %s943_s20 = smov (!%p710_p13), 5  }
  0x18   : > { %s757_s7 = smul.u32 48, %s179_s6 }
  0x1a   : > { %s1060_s10 = scalar_lea.vmem %s1263_s0, %s757_s7 }
  0x1c   : > { %v221_v0 = vld [vmem:[%s1060_s10] sm:$0xff]  ;;  %vm187_vm0 = vcmask 39936   ;;  %v222_v1 = vld [vmem:[%s1060_s10 + $0x18] sm:$0xf]  ;;  %v944_v3 = vmov 0.0   ;;  %vm189_vm1 = vcmask 35840  }
  0x1d   : > { %225 = vrot.lane.b32.xlu1 %v221_v0, %s943_s20  ;;  %195 = vrot.lane.b32.xlu0 %v221_v0, %s943_s20  ;;  %v192_v2 = vld [vmem:[%s1060_s10 + $0x18] sm:$0xf]  ;;  %188 = vst.msk [vmem:[#allocation2] sm:$0xff] %vm187_vm0, %v944_v3  ;;  %v235_v4 = vld [vmem:[%s1060_s10 + $0x20] sm:$0xf]  ;;  %vm201_vm2 = vcmask 1047592  }
  0x1e   : > { %190 = vst.msk [vmem:[#allocation2 + $0x10] sm:$0xf] %vm189_vm1, %v944_v3  ;;  %v234_v5 = vld [vmem:[%s1060_s10 + $0x8] sm:$0xff]  ;;  %v261_v6 = vld [vmem:[%s1060_s10 + $0x20] sm:$0xf]  ;;  %v273_v8 = vld [vmem:[%s1060_s10 + $0x10] sm:$0xff] }
  0x1f   : > { %v274_v7 = vld [vmem:[%s1060_s10 + $0x28] sm:$0xf]  ;;  %v208_v9 = vld [vmem:[%s1060_s10 + $0x20] sm:$0xf]  ;;  %vm204_vm3 = vcmask 1043496   ;;  %vm219_vm4 = vcmask 76840  }
  0x20   : > { %v249_v10 = vld [vmem:[%s1060_s10 + $0x28] sm:$0xf]  ;;  %vm217_vm5 = vcmask 80936  }
  0x21   : > { %227 = vrot.lane.b32.xlu1 %v222_v1, %s943_s20  ;;  %197 = vrot.lane.b32.xlu0 %v192_v2, %s943_s20 }
  0x25   : > { %240 = vrot.lane.b32.xlu1 %v235_v4, %s943_s20  ;;  %238 = vrot.lane.b32.xlu0 %v234_v5, %s943_s20 }
  0x29   : > { %266 = vrot.lane.b32.xlu1 %v261_v6, %s943_s20  ;;  %264 = vrot.lane.b32.xlu0 %v234_v5, %s943_s20 }
  0x2d   : > { %279 = vrot.lane.b32.xlu1 %v274_v7, %s943_s20  ;;  %277 = vrot.lane.b32.xlu0 %v273_v8, %s943_s20 }
  0x31   : > { %213 = vrot.lane.b32.xlu1 %v208_v9, %s943_s20  ;;  %211 = vrot.lane.b32.xlu0 %v234_v5, %s943_s20 }
  0x35   : > { %254 = vrot.lane.b32.xlu1 %v249_v10, %s943_s20  ;;  %252 = vrot.lane.b32.xlu0 %v273_v8, %s943_s20 }
  0x8f   : > { %v226_v11 = vpop.permute.xlu1 %225  ;;  %v196_v12 = vpop.permute.xlu0 %195 }
  0x90   : > { %232 = vst.msk [vmem:[#allocation2 + $0x20] sm:$0xff] %vm187_vm0, %v226_v11  ;;  %203 = vst.msk [vmem:[#allocation2 + $0x8] sm:$0xff] %vm187_vm0, %v196_v12 }
  0x91   : > { %202 = vst.msk [vmem:[#allocation2] sm:$0xff] %vm201_vm2, %v196_v12 }
  0x93   : > { %v228_v13 = vpop.permute.xlu1 %227  ;;  %v198_v14 = vpop.permute.xlu0 %197 }
  0x94   : > { %233 = vst.msk [vmem:[#allocation2 + $0x30] sm:$0xf] %vm189_vm1, %v228_v13  ;;  %206 = vst.msk [vmem:[#allocation2 + $0x18] sm:$0xf] %vm189_vm1, %v198_v14 }
  0x95   : > { %205 = vst.msk [vmem:[#allocation2 + $0x10] sm:$0xf] %vm204_vm3, %v198_v14 }
  0x97   : > { %v241_v15 = vpop.permute.xlu1 %240  ;;  %v239_v16 = vpop.permute.xlu0 %238 }
  0x98   : > { %246 = vst.msk [vmem:[#allocation2 + $0x30] sm:$0xf] %vm204_vm3, %v241_v15 }
  0x99   : > { %247 = vst.msk [vmem:[#allocation2 + $0x38] sm:$0xf] %vm189_vm1, %v241_v15 }
  0x9a   : > { %244 = vst.msk [vmem:[#allocation2 + $0x20] sm:$0xff] %vm201_vm2, %v239_v16 }
  0x9b   : > { %245 = vst.msk [vmem:[#allocation2 + $0x28] sm:$0xff] %vm187_vm0, %v239_v16  ;;  %v267_v17 = vpop.permute.xlu1 %266  ;;  %v265_v18 = vpop.permute.xlu0 %264 }
  0x9c   : > { %272 = vst.msk [vmem:[#allocation2 + $0x50] sm:$0xf] %vm189_vm1, %v267_v17 }
  0x9d   : > { %271 = vst.msk [vmem:[#allocation2 + $0x40] sm:$0xff] %vm187_vm0, %v265_v18 }
  0x9f   : > { %v280_v19 = vpop.permute.xlu1 %279  ;;  %v278_v20 = vpop.permute.xlu0 %277 }
  0xa0   : > { %285 = vst.msk [vmem:[#allocation2 + $0x50] sm:$0xf] %vm204_vm3, %v280_v19 }
  0xa1   : > { %286 = vst.msk [vmem:[#allocation2 + $0x58] sm:$0xf] %vm189_vm1, %v280_v19 }
  0xa2   : > { %283 = vst.msk [vmem:[#allocation2 + $0x40] sm:$0xff] %vm201_vm2, %v278_v20 }
  0xa3   : > { %284 = vst.msk [vmem:[#allocation2 + $0x48] sm:$0xff] %vm187_vm0, %v278_v20  ;;  %v214_v21 = vpop.permute.xlu1 %213  ;;  %v212_v22 = vpop.permute.xlu0 %211 }
  0xa4   : > { %288 = vst.msk [vmem:[#allocation2 + $0x58] sm:$0xf] %vm219_vm4, %v944_v3  ;;  %220 = vst.msk [vmem:[#allocation2 + $0x18] sm:$0xf] %vm219_vm4, %v214_v21 }
  0xa5   : > { %287 = vst.msk [vmem:[#allocation2 + $0x48] sm:$0xff] %vm217_vm5, %v944_v3  ;;  %218 = vst.msk [vmem:[#allocation2 + $0x8] sm:$0xff] %vm217_vm5, %v212_v22 }
  0xa7   : > { %v255_v23 = vpop.permute.xlu1 %254  ;;  %v253_v24 = vpop.permute.xlu0 %252 }
  0xa8   : > { %259 = vst.msk [vmem:[#allocation2 + $0x38] sm:$0xf] %vm219_vm4, %v255_v23 }
  0xa9   : > { %258 = vst.msk [vmem:[#allocation2 + $0x28] sm:$0xff] %vm217_vm5, %v253_v24 }
  0xaa PF: > { %s722_s21 = sshll.u32 %s925_s15, 5  ;;  %v945_v25 = vmov 0.0   ;;  %s946_s27 = smov 119   ;;  %v453_v30 = vld [vmem:[%s1264_s1 + $0x8] sm:$0xff]  ;;  %vm501_vm6 = vcmask 31744   ;;  %v477_v33 = vld [vmem:[%s1265_s2] sm:$0xff] }
  0xab   : > { %518 = vmatprep.subr.mxu0 %v945_v25  ;;  %723 = vmatprep.subr.mxu1 %v945_v25  ;;  %s291_s24 = scalar_lea.vmem [#allocation2], %s722_s21  ;;  %s947_s28 = smov 118   ;;  %v457_v31 = vld [vmem:[%s1264_s1 + $0x28] sm:$0xff]  ;;  %v956_v34 = vmov 0   ;;  %v479_v35 = vld [vmem:[%s1265_s2 + $0x10] sm:$0xff]  ;;  %v480_v36 = vld [vmem:[%s1265_s2 + $0x18] sm:$0xff] }
  0xac   : > { %s948_s29 = smov 120   ;;  %s949_s5 = smov 121   ;;  %714 = vmatprep.mubr.msk.f32.mxu0 %vm501_vm6, %v453_v30  ;;  %716 = vmatprep.mubr.msk.f32.mxu1 %vm501_vm6, %v457_v31  ;;  %v478_v32 = vld [vmem:[%s1265_s2 + $0x8] sm:$0xff]  ;;  %vm430_vm7 = vcmask 973824   ;;  %vm445_vm8 = vcmask 965632   ;;  %vm415_vm9 = vcmask 982016  }
  0xad   : > { %s950_s6 = smov 122   ;;  %s951_s7 = smov 123   ;;  %848 = vset.pattern.permute.xlu1 %v956_v34  ;;  %847 = vset.pattern.permute.xlu0 %v956_v34  ;;  %vm400_vm10 = vcmask 990208   ;;  %vm385_vm11 = vcmask 998400   ;;  %vm370_vm12 = vcmask 1006592   ;;  %vm355_vm13 = vcmask 1014784  }
  0xae   : > { %s952_s8 = smov 124   ;;  %s953_s9 = smov 125   ;;  %vm340_vm14 = vcmask 1022976   ;;  %vm325_vm15 = vcmask 1031168   ;;  %vm310_vm0 = vcmask 1039360   ;;  %vm514_vm1 = vcmask 1043456  }
  0xaf   : > { %s954_s10 = smov 126   ;;  %s955_s20 = smov 127  }
  0xb0   : > { %v1096_v26 = vld [vmem:[%s291_s24] sm:$0xff]  ;;  %v294_v27 = vld [vmem:[%s291_s24 + $0x10] sm:$0xf]  ;;  %v293_v28 = vld [vmem:[%s291_s24 + $0x8] sm:$0xff] }
  0xb1   : > { %422 = vrot.lane.b32.xlu1 %v1096_v26, %s946_s27  ;;  %437 = vrot.lane.b32.xlu0 %v1096_v26, %s947_s28  ;;  %297 = vst [vmem:[#allocation3 + $0x8] sm:$0xf] %v294_v27  ;;  %v295_v29 = vld [vmem:[%s291_s24 + $0x18] sm:$0xf] }
  0xb5   : > { %424 = vrot.lane.b32.xlu1 %v293_v28, %s946_s27  ;;  %439 = vrot.lane.b32.xlu0 %v293_v28, %s947_s28 }
  0xb9   : > { %428 = vrot.lane.b32.xlu1 %v295_v29, %s946_s27  ;;  %426 = vrot.lane.b32.xlu0 %v294_v27, %s946_s27 }
  0xbd   : > { %413 = vrot.lane.b32.xlu1 %v295_v29, %s948_s29  ;;  %411 = vrot.lane.b32.xlu0 %v294_v27, %s948_s29 }
  0xc1   : > { %409 = vrot.lane.b32.xlu1 %v293_v28, %s948_s29  ;;  %407 = vrot.lane.b32.xlu0 %v1096_v26, %s948_s29  ;;  %s626_s29 = sshll.u32 %s1062_s11, 4  ;;  %s1206_s29 = int_to_ptr.vmem [resolvable:$true] %s626_s29 }
  0xc5   : > { %394 = vrot.lane.b32.xlu1 %v293_v28, %s949_s5  ;;  %392 = vrot.lane.b32.xlu0 %v1096_v26, %s949_s5 }
  0xc9   : > { %398 = vrot.lane.b32.xlu1 %v295_v29, %s949_s5  ;;  %396 = vrot.lane.b32.xlu0 %v294_v27, %s949_s5 }
  0xcd   : > { %383 = vrot.lane.b32.xlu1 %v295_v29, %s950_s6  ;;  %381 = vrot.lane.b32.xlu0 %v294_v27, %s950_s6 }
  0xd1   : > { %379 = vrot.lane.b32.xlu1 %v293_v28, %s950_s6  ;;  %377 = vrot.lane.b32.xlu0 %v1096_v26, %s950_s6  ;;  %s1212_s6 = scalar_lea.sflag [#allocation5], %s175_s4 }
  0xd5   : > { %364 = vrot.lane.b32.xlu1 %v293_v28, %s951_s7  ;;  %362 = vrot.lane.b32.xlu0 %v1096_v26, %s951_s7 }
  0xd9   : > { %368 = vrot.lane.b32.xlu1 %v295_v29, %s951_s7  ;;  %366 = vrot.lane.b32.xlu0 %v294_v27, %s951_s7  ;;  %s849_s7 = scalar_lea.vmem %s1206_s29, 512 }
  0xda   : > { %p850_p0 = scmp.ne.s32.totalorder %s1206_s29, %s849_s7 }
  0xdc   : > { %p851_p1 = pnand %p850_p0, %p1032_p3 }
  0xdd   : > { %353 = vrot.lane.b32.xlu1 %v295_v29, %s952_s8  ;;  %351 = vrot.lane.b32.xlu0 %v294_v27, %s952_s8 }
  0xde   : > { %p852_p2 = pneg %p851_p1 }
  0xe1   : > { %349 = vrot.lane.b32.xlu1 %v293_v28, %s952_s8  ;;  %347 = vrot.lane.b32.xlu0 %v1096_v26, %s952_s8  ;;  %s957_s8 = smov [#allocation4]  }
  0xe5   : > { %334 = vrot.lane.b32.xlu1 %v293_v28, %s953_s9  ;;  %332 = vrot.lane.b32.xlu0 %v1096_v26, %s953_s9 }
  0xe9   : > { %338 = vrot.lane.b32.xlu1 %v295_v29, %s953_s9  ;;  %336 = vrot.lane.b32.xlu0 %v294_v27, %s953_s9  ;;  %s853_s9 = sshll.u32 %s957_s8, 4  ;;  %s854_s9 = int_to_ptr.vmem [resolvable:$false] %s853_s9 }
  0xea   : > { %p856_p4 = scmp.lt.s32.totalorder %s1206_s29, %s854_s9 }
  0xed   : > { %323 = vrot.lane.b32.xlu1 %v295_v29, %s954_s10  ;;  %321 = vrot.lane.b32.xlu0 %v294_v27, %s954_s10 }
  0xf1   : > { %319 = vrot.lane.b32.xlu1 %v293_v28, %s954_s10  ;;  %317 = vrot.lane.b32.xlu0 %v1096_v26, %s954_s10  ;;  %s855_s10 = scalar_lea.vmem %s854_s9, 1024 }
  0xf2   : > { %p857_p5 = scmp.lt.s32.totalorder %s855_s10, %s849_s7 }
  0xf4   : > { %p858_p6 = por %p857_p5, %p856_p4 }
  0xf5   : > { %304 = vrot.lane.b32.xlu1 %v293_v28, %s955_s20  ;;  %302 = vrot.lane.b32.xlu0 %v1096_v26, %s955_s20 }
  0xf6   : > { %p859_p7 = pnand %p858_p6, %p852_p2 }
  0xf9   : > { %308 = vrot.lane.b32.xlu1 %v295_v29, %s955_s20  ;;  %306 = vrot.lane.b32.xlu0 %v294_v27, %s955_s20 }
  0xfd   : > { %443 = vrot.lane.b32.xlu1 %v295_v29, %s947_s28  ;;  %441 = vrot.lane.b32.xlu0 %v294_v27, %s947_s28  ;;  %s758_s28 = smul.u32 12, %s929_s16 }
  0xff   : > { %s623_s24 = sadd.s32 %s925_s15, %s758_s28 }
 0x100   : > { %s719_s27 = sshll.u32 %s623_s24, 7 }
 0x101   : > { %488 = vperm.xlu1 %848, %v478_v32   ;;  %483 = vperm.xlu0 %847, %v477_v33   ;;  %s1204_s5 = scalar_lea.hbm %s1266_s3, %s719_s27 }
 0x105   : > { %493 = vperm.xlu1 %848, %v479_v35   ;;  %498 = vperm.xlu0 %847, %v480_v36  }
 0x123   : > { %v423_v37 = vpop.permute.xlu1 %422  ;;  %v438_v38 = vpop.permute.xlu0 %437 }
 0x127   : > { %v425_v39 = vpop.permute.xlu1 %424  ;;  %v440_v40 = vpop.permute.xlu0 %439 }
 0x128   : > { %v431_v41 = vsel %vm430_vm7, %v423_v37, %v425_v39  ;;  %v446_v42 = vsel %vm445_vm8, %v438_v38, %v440_v40 }
 0x129   : > { %435 = vst [vmem:[#allocation3 + $0x6c] sm:$0xff] %v431_v41  ;;  %519 = vmatpush1.msra.mxu0 %v446_v42  ;;  %740 = vmatpush1.msra.mxu1 %v446_v42 }
 0x12a   : > { %520 = vmatprep.subr.mxu0 %v945_v25  ;;  %724 = vmatprep.subr.mxu1 %v945_v25 }
 0x12b   : > { %v429_v43 = vpop.permute.xlu1 %428  ;;  %v427_v44 = vpop.permute.xlu0 %426 }
 0x12c   : > { %v432_v45 = vsel %vm430_vm7, %v427_v44, %v429_v43 }
 0x12d   : > { %436 = vst [vmem:[#allocation3 + $0x74] sm:$0xf] %v432_v45 }
 0x12f   : > { %v414_v46 = vpop.permute.xlu1 %413  ;;  %v412_v47 = vpop.permute.xlu0 %411 }
 0x130   : > { %v417_v48 = vsel %vm415_vm9, %v412_v47, %v414_v46  ;;  %v452_v46 = vld [vmem:[%s1264_s1] sm:$0xff] }
 0x131   : > { %421 = vst [vmem:[#allocation3 + $0x68] sm:$0xf] %v417_v48  ;;  %v456_v47 = vld [vmem:[%s1264_s1 + $0x20] sm:$0xff]  ;;  %v455_v48 = vld [vmem:[%s1264_s1 + $0x18] sm:$0xff] }
 0x133   : > { %v410_v49 = vpop.permute.xlu1 %409  ;;  %v408_v50 = vpop.permute.xlu0 %407 }
 0x134   : > { %v416_v51 = vsel %vm415_vm9, %v408_v50, %v410_v49  ;;  %v474_v52 = vld [vmem:[#allocation3 + $0x70] sm:$0xff] }
 0x135   : > { %521 = vmatpush1.msra.mxu0 %v474_v52  ;;  %741 = vmatpush1.msra.mxu1 %v474_v52  ;;  %v458_v49 = vld [vmem:[%s1264_s1 + $0x30] sm:$0xff] }
 0x136   : > { %522 = vmatprep.subr.mxu0 %v945_v25  ;;  %725 = vmatprep.subr.mxu1 %v945_v25 }
 0x137   : > { %v395_v53 = vpop.permute.xlu1 %394  ;;  %v393_v54 = vpop.permute.xlu0 %392 }
 0x138   : > { %v401_v55 = vsel %vm400_vm10, %v393_v54, %v395_v53  ;;  %v473_v56 = vld [vmem:[#allocation3 + $0x68] sm:$0xff] }
 0x139   : > { %405 = vst [vmem:[#allocation3 + $0x54] sm:$0xff] %v401_v55  ;;  %523 = vmatpush1.msra.mxu0 %v473_v56  ;;  %742 = vmatpush1.msra.mxu1 %v473_v56 }
 0x13a   : > { %524 = vmatprep.subr.mxu0 %v945_v25  ;;  %726 = vmatprep.subr.mxu1 %v945_v25 }
 0x13b   : > { %v399_v57 = vpop.permute.xlu1 %398  ;;  %v397_v58 = vpop.permute.xlu0 %396  ;;  %525 = vmatpush1.msra.mxu0 %v416_v51  ;;  %743 = vmatpush1.msra.mxu1 %v416_v51 }
 0x13c   : > { %v402_v59 = vsel %vm400_vm10, %v397_v58, %v399_v57  ;;  %526 = vmatprep.subr.mxu0 %v945_v25  ;;  %727 = vmatprep.subr.mxu1 %v945_v25 }
 0x13d   : > { %406 = vst [vmem:[#allocation3 + $0x5c] sm:$0xf] %v402_v59 }
 0x13f   : > { %v384_v60 = vpop.permute.xlu1 %383  ;;  %v382_v61 = vpop.permute.xlu0 %381 }
 0x140   : > { %v387_v62 = vsel %vm385_vm11, %v382_v61, %v384_v60 }
 0x141   : > { %391 = vst [vmem:[#allocation3 + $0x50] sm:$0xf] %v387_v62 }
 0x143   : > { %v380_v63 = vpop.permute.xlu1 %379  ;;  %v378_v0 = vpop.permute.xlu0 %377 }
 0x144   : > { %v386_v1 = vsel %vm385_vm11, %v378_v0, %v380_v63  ;;  %v471_v2 = vld [vmem:[#allocation3 + $0x58] sm:$0xff] }
 0x145   : > { %527 = vmatpush1.msra.mxu0 %v471_v2  ;;  %744 = vmatpush1.msra.mxu1 %v471_v2 }
 0x146   : > { %528 = vmatprep.subr.mxu0 %v945_v25  ;;  %728 = vmatprep.subr.mxu1 %v945_v25 }
 0x147   : > { %v365_v3 = vpop.permute.xlu1 %364  ;;  %v363_v4 = vpop.permute.xlu0 %362 }
 0x148   : > { %v371_v5 = vsel %vm370_vm12, %v363_v4, %v365_v3  ;;  %v470_v6 = vld [vmem:[#allocation3 + $0x50] sm:$0xff] }
 0x149   : > { %375 = vst [vmem:[#allocation3 + $0x3c] sm:$0xff] %v371_v5  ;;  %529 = vmatpush1.msra.mxu0 %v470_v6  ;;  %745 = vmatpush1.msra.mxu1 %v470_v6 }
 0x14a   : > { %530 = vmatprep.subr.mxu0 %v945_v25  ;;  %729 = vmatprep.subr.mxu1 %v945_v25 }
 0x14b   : > { %v369_v7 = vpop.permute.xlu1 %368  ;;  %v367_v8 = vpop.permute.xlu0 %366  ;;  %531 = vmatpush1.msra.mxu0 %v386_v1  ;;  %746 = vmatpush1.msra.mxu1 %v386_v1 }
 0x14c   : > { %v372_v9 = vsel %vm370_vm12, %v367_v8, %v369_v7  ;;  %532 = vmatprep.subr.mxu0 %v945_v25  ;;  %730 = vmatprep.subr.mxu1 %v945_v25 }
 0x14d   : > { %376 = vst [vmem:[#allocation3 + $0x44] sm:$0xf] %v372_v9 }
 0x14f   : > { %v354_v10 = vpop.permute.xlu1 %353  ;;  %v352_v11 = vpop.permute.xlu0 %351 }
 0x150   : > { %v357_v12 = vsel %vm355_vm13, %v352_v11, %v354_v10 }
 0x151   : > { %361 = vst [vmem:[#allocation3 + $0x38] sm:$0xf] %v357_v12 }
 0x153   : > { %v350_v13 = vpop.permute.xlu1 %349  ;;  %v348_v14 = vpop.permute.xlu0 %347 }
 0x154   : > { %v356_v15 = vsel %vm355_vm13, %v348_v14, %v350_v13  ;;  %v468_v16 = vld [vmem:[#allocation3 + $0x40] sm:$0xff] }
 0x155   : > { %533 = vmatpush1.msra.mxu0 %v468_v16  ;;  %747 = vmatpush1.msra.mxu1 %v468_v16 }
 0x156   : > { %534 = vmatprep.subr.mxu0 %v945_v25  ;;  %731 = vmatprep.subr.mxu1 %v945_v25 }
 0x157   : > { %v335_v17 = vpop.permute.xlu1 %334  ;;  %v333_v18 = vpop.permute.xlu0 %332 }
 0x158   : > { %v341_v19 = vsel %vm340_vm14, %v333_v18, %v335_v17  ;;  %v467_v20 = vld [vmem:[#allocation3 + $0x38] sm:$0xff] }
 0x159   : > { %345 = vst [vmem:[#allocation3 + $0x24] sm:$0xff] %v341_v19  ;;  %535 = vmatpush1.msra.mxu0 %v467_v20  ;;  %748 = vmatpush1.msra.mxu1 %v467_v20 }
 0x15a   : > { %536 = vmatprep.subr.mxu0 %v945_v25  ;;  %732 = vmatprep.subr.mxu1 %v945_v25 }
 0x15b   : > { %v339_v21 = vpop.permute.xlu1 %338  ;;  %v337_v22 = vpop.permute.xlu0 %336  ;;  %537 = vmatpush1.msra.mxu0 %v356_v15  ;;  %749 = vmatpush1.msra.mxu1 %v356_v15 }
 0x15c   : > { %v342_v23 = vsel %vm340_vm14, %v337_v22, %v339_v21  ;;  %538 = vmatprep.subr.mxu0 %v945_v25  ;;  %733 = vmatprep.subr.mxu1 %v945_v25 }
 0x15d   : > { %346 = vst [vmem:[#allocation3 + $0x2c] sm:$0xf] %v342_v23 }
 0x15f   : > { %v324_v24 = vpop.permute.xlu1 %323  ;;  %v322_v27 = vpop.permute.xlu0 %321 }
 0x160   : > { %v327_v28 = vsel %vm325_vm15, %v322_v27, %v324_v24 }
 0x161   : > { %331 = vst [vmem:[#allocation3 + $0x20] sm:$0xf] %v327_v28 }
 0x163   : > { %v320_v29 = vpop.permute.xlu1 %319  ;;  %v318_v30 = vpop.permute.xlu0 %317 }
 0x164   : > { %v326_v31 = vsel %vm325_vm15, %v318_v30, %v320_v29  ;;  %v465_v32 = vld [vmem:[#allocation3 + $0x28] sm:$0xff] }
 0x165   : > { %539 = vmatpush1.msra.mxu0 %v465_v32  ;;  %750 = vmatpush1.msra.mxu1 %v465_v32 }
 0x166   : > { %540 = vmatprep.subr.mxu0 %v945_v25  ;;  %734 = vmatprep.subr.mxu1 %v945_v25 }
 0x167   : > { %v305_v33 = vpop.permute.xlu1 %304  ;;  %v303_v34 = vpop.permute.xlu0 %302 }
 0x168   : > { %v311_v35 = vsel %vm310_vm0, %v303_v34, %v305_v33  ;;  %v464_v36 = vld [vmem:[#allocation3 + $0x20] sm:$0xff] }
 0x169   : > { %315 = vst [vmem:[#allocation3 + $0xc] sm:$0xff] %v311_v35  ;;  %541 = vmatpush1.msra.mxu0 %v464_v36  ;;  %751 = vmatpush1.msra.mxu1 %v464_v36 }
 0x16a   : > { %542 = vmatprep.subr.mxu0 %v945_v25  ;;  %735 = vmatprep.subr.mxu1 %v945_v25 }
 0x16b   : > { %v309_v37 = vpop.permute.xlu1 %308  ;;  %v307_v38 = vpop.permute.xlu0 %306  ;;  %543 = vmatpush1.msra.mxu0 %v326_v31  ;;  %752 = vmatpush1.msra.mxu1 %v326_v31 }
 0x16c   : > { %v312_v39 = vsel %vm310_vm0, %v307_v38, %v309_v37  ;;  %544 = vmatprep.subr.mxu0 %v945_v25  ;;  %736 = vmatprep.subr.mxu1 %v945_v25 }
 0x16d   : > { %316 = vst [vmem:[#allocation3 + $0x14] sm:$0xf] %v312_v39 }
 0x16f   : > { %v444_v40 = vpop.permute.xlu1 %443  ;;  %v442_v41 = vpop.permute.xlu0 %441 }
 0x170   : > { %v447_v42 = vsel %vm445_vm8, %v442_v41, %v444_v40  ;;  %v461_v44 = vld [vmem:[#allocation3 + $0x8] sm:$0xff] }
 0x171   : > { %451 = vst [vmem:[#allocation3 + $0x80] sm:$0xf] %v447_v42 }
 0x174   : > { %v462_v43 = vld [vmem:[#allocation3 + $0x10] sm:$0xff] }
 0x175   : > { %545 = vmatpush1.msra.mxu0 %v462_v43  ;;  %753 = vmatpush1.msra.mxu1 %v462_v43 }
 0x176   : > { %546 = vmatprep.subr.mxu0 %v945_v25  ;;  %737 = vmatprep.subr.mxu1 %v945_v25 }
 0x177   : > { %547 = vmatpush1.msra.mxu0 %v461_v44  ;;  %754 = vmatpush1.msra.mxu1 %v461_v44 }
 0x178   : > { %548 = vmatprep.subr.mxu0 %v945_v25  ;;  %738 = vmatprep.subr.mxu1 %v945_v25  ;;  %v476_v45 = vld [vmem:[#allocation3 + $0x80] sm:$0xf] }
 0x179   : > { %549 = vmatpush1.msra.mxu0 %v1096_v26  ;;  %755 = vmatpush1.msra.mxu1 %v1096_v26  ;;  %v459_v26 = vld [vmem:[%s1264_s1 + $0x38] sm:$0xff] }
 0x17a   : > { %580 = vmatprep.subr.mxu0 %v945_v25  ;;  %739 = vmatprep.subr.mxu1 %v945_v25  ;;  %v454_v25 = vld [vmem:[%s1264_s1 + $0x10] sm:$0xff] }
 0x17b   : > { %713 = vmatpush2.msk.msra.mxu0 %vm514_vm1, %v476_v45  ;;  %756 = vmatpush2.msk.msra.mxu1 %vm514_vm1, %v476_v45 }
 0x17c   : > { %583 = vmatmul.mubr.f32.vlgmr.msra.gmra.mxu0 %v452_v46  ;;  %593 = vmatmul.mubr.f32.vlgmr.msra.gmra.mxu1 %v456_v47  ;;  %v489_v50 = vpop.permute.xlu1 %488  ;;  %v484_v51 = vpop.permute.xlu0 %483 }
 0x17d   : > { %715 = vmatprep.mubr.msk.f32.mxu0 %vm501_vm6, %v455_v48  ;;  %717 = vmatprep.mubr.msk.f32.mxu1 %vm501_vm6, %v459_v26 }
 0x180   : > { %588 = vmatmul.mubr.f32.gmra.mxu0 %v454_v25  ;;  %598 = vmatmul.mubr.f32.gmra.mxu1 %v458_v49  ;;  %v494_v52 = vpop.permute.xlu1 %493  ;;  %v499_v59 = vpop.permute.xlu0 %498 }
 0x23c   : > { %v584_v53 = vpop.f32.mrf.mxu0  ;;  %v594_v54 = vpop.f32.mrf.mxu1 }
 0x23d   : > { %v585_v55 = vadd.f32 %v584_v53, %v484_v51  ;;  %v595_v56 = vadd.f32 %v594_v54, %v494_v52 }
 0x23e   : > { %v586_v57 = vpop.f32.mrf.mxu0  ;;  %v596_v58 = vpop.f32.mrf.mxu1 }
 0x23f   : > { %v603_v60 = vmax.f32 %v585_v55, 0.0  ;;  %v605_v61 = vmax.f32 %v595_v56, 0.0 }
 0x240   : > { %v589_v62 = vpop.f32.mrf.mxu0  ;;  %v599_v63 = vpop.f32.mrf.mxu1 }
 0x241   : > { %607 = vst [vmem:[%s1062_s11] sm:$0xff] %v603_v60  ;;  %609 = vst [vmem:[%s1062_s11 + $0x10] sm:$0xff] %v605_v61  ;;  %v590_v0 = vadd.f32 %v589_v62, %v489_v50  ;;  %v600_v1 = vadd.f32 %v599_v63, %v499_v59 }
 0x242   : > { %v591_v2 = vpop.f32.mrf.mxu0  ;;  %v601_v3 = vpop.f32.mrf.mxu1 }
 0x243   : > { %v604_v4 = vmax.f32 %v590_v0, 0.0  ;;  %v606_v5 = vmax.f32 %v600_v1, 0.0 }
 0x245   : > { %608 = vst [vmem:[%s1062_s11 + $0x8] sm:$0xff] %v604_v4  ;;  %610 = vst [vmem:[%s1062_s11 + $0x18] sm:$0xff] %v606_v5 }
 0x246   : > { %862 = shalt.err (!%p859_p7)
}
 0x247   : > { %s863_s4 = scalar_lea.hbm %s1204_s5, 512  ;;  %s867_s21 = scalar_lea.hbm %s1266_s3, 3072 }
 0x248   : > { %p864_p9 = scmp.ne.s32.totalorder %s1204_s5, %s863_s4  ;;  %p868_p12 = scmp.lt.s32.totalorder %s1204_s5, %s1266_s3 }
 0x249   : > { %p869_p13 = scmp.lt.s32.totalorder %s867_s21, %s863_s4 }
 0x24a   : > { %p865_p10 = pnand %p864_p9, %p1032_p3 }
 0x24b   : > { %p870_p0 = por %p869_p13, %p868_p12 }
 0x24c   : > { %p866_p11 = pneg %p865_p10 }
 0x24e   : > { %p871_p1 = pnand %p870_p0, %p866_p11 }
 0x250   : > { %874 = shalt.err (!%p871_p1)
}
 0x251   : > { %s958_s27 = smov 128   ;;  %s959_s15 = smov 384  }
 0x252   : > { %s960_s16 = smov 8  }
 0x253   : > { %759 = dma.vmem_to_hbm [thread:$0]  (%p1032_p3), %s1206_s29, 512, %s1204_s5, %s1212_s6, %s958_s27, %s959_s15, %s960_s16  }
 0x254 PF: > { %p765_p2 = scmp.ge.s32.totalorder %s941_s19, 2  ;;  %s641_s7 = sand.u32 1, %s913_s12  }
 0x255   : > { %s642_s8 = scalar_lea.sflag [#allocation5], %s641_s7 }
 0x256   : > { %p762_p4 = pnand %p765_p2, %p1041_p8 }
 0x258   : > { %p763_p5 = pneg %p762_p4 }
 0x25a   : > { %908 = dma.done.wait (%p763_p5), %s642_s8, 512  }
 0x25b   : > { %910 = vsyncadd (%p763_p5), %s642_s8, 4294966784  ;;  %s16_s19 = sadd.s32 1, %s941_s19   ;;  %s1269_s12 = smov %s917_s13 }
 0x25c   : > { %p13_p6 = scmp.ge.s32.totalorder %s16_s19, 8   ;;  %s1270_s13 = smov %s921_s14 }
 0x25d   : > { %s1271_s14 = smov %s1050_s30  ;;  %s1272_s15 = smov %s933_s17 }
 0x25e   : > { %s1273_s16 = smov %s937_s18  ;;  %s1274_s17 = smov %s1277_s22 }
 0x25f   : > { %s1275_s18 = smov %s1281_s23  ;;  %15 = sbr.rel (!%p13_p6) target bundleno = 5 (0x5), region = 74 }
 0x264   :  { %647 = vsyncpa [#allocation5], 1 }
 0x265   :  { %649 = vsyncpa [#allocation5 + $0x1], 1 }

</bundles_post_ra>
